<compile_context>
chip_gen: v7x
topology: tpu7x:2x2x1
jax: 0.10.0
libtpu: 0.0.40
codegen_flags: <defaults>
</compile_context>

<pallas_src>
import functools

import numpy as np
import jax
import jax.numpy as jnp
from jax import lax
from jax.experimental import pallas as pl
from jax.experimental.pallas import tpu as pltpu

BN_EPS = 1e-5  # SynchronizedBatchNorm2d default eps


# ---------------------------------------------------------------------------
# Fused Decoder kernel (pure 2D matmuls + elementwise ops, all lane-dense).
# ---------------------------------------------------------------------------
def _decoder_kernel(xr_ref, m1_ref, a1_ref, w1b_ref, p1_ref, g1_ref, b1_ref,
                    d2_ref, w2b_ref, p2_ref, g2_ref, b2_ref, out_ref,
                    *, inv_count):
    f32 = jnp.float32

    def bn_relu(acc, pool_ref, g_ref, b_ref):
        # One-pass BatchNorm statistics (biased variance, train mode) + ReLU.
        rs = jnp.sum(acc, axis=0, keepdims=True)           # (1, Wo*C)
        rss = jnp.sum(acc * acc, axis=0, keepdims=True)    # (1, Wo*C)
        # One matmul both reduces over the spatial-x lanes and broadcasts the
        # per-channel totals back to every lane of that channel.
        csum = jnp.dot(rs, pool_ref[...], preferred_element_type=f32)
        csq = jnp.dot(rss, pool_ref[...], preferred_element_type=f32)
        mean = csum * inv_count
        var = jnp.maximum(csq * inv_count - mean * mean, 0.0)
        scale = g_ref[...] * lax.rsqrt(var + BN_EPS)
        shift = b_ref[...] - mean * scale
        return jnp.maximum(acc * scale + shift, 0.0)

    # ---- bilinear x2 upsample (align_corners=True), width direction --------
    # t[(n,h), x*Cin+ci] = sum_w x[n,ci,h,w] * Aw[x,w]
    t = jnp.dot(xr_ref[...], m1_ref[...], preferred_element_type=f32)

    # ---- conv1: per kernel-row dy, (height-upsample + dy-shift) matmul then
    #      banded width/channel matmul ---------------------------------------
    acc1 = None
    for dy in range(3):
        s = jnp.dot(a1_ref[dy], t, preferred_element_type=f32)    # (N*Ho, Wo*Cin)
        c = jnp.dot(s, w1b_ref[dy], preferred_element_type=f32)   # (N*Ho, Wo*C1)
        acc1 = c if acc1 is None else acc1 + c
    y1 = bn_relu(acc1, p1_ref, g1_ref, b1_ref)

    # ---- conv2 --------------------------------------------------------------
    acc2 = None
    for dy in range(3):
        s = jnp.dot(d2_ref[dy], y1, preferred_element_type=f32)   # (N*Ho, Wo*C1)
        c = jnp.dot(s, w2b_ref[dy], preferred_element_type=f32)   # (N*Ho, Wo*Cout)
        acc2 = c if acc2 is None else acc2 + c

    out_ref[...] = bn_relu(acc2, p2_ref, g2_ref, b2_ref)          # (N*Ho, Wo*Cout)


# ---------------------------------------------------------------------------
# Host-side (numpy) constant builders.
# ---------------------------------------------------------------------------
def _interp_matrix(n_in, n_out):
    """1-D bilinear interpolation matrix, align_corners=True."""
    A = np.zeros((n_out, n_in), np.float32)
    if n_in == 1:
        A[:, 0] = 1.0
        return A
    src = np.arange(n_out, dtype=np.float64) * (n_in - 1) / (n_out - 1)
    i0 = np.clip(np.floor(src).astype(np.int64), 0, n_in - 1)
    i1 = np.minimum(i0 + 1, n_in - 1)
    frac = (src - i0).astype(np.float32)
    for o in range(n_out):
        A[o, i0[o]] += 1.0 - frac[o]
        A[o, i1[o]] += frac[o]
    return A


def _width_upsample_matrix(Aw, Cin):
    """(Cin*W, Wo*Cin): M[ci*W+w, x*Cin+ci] = Aw[x, w]."""
    Wo, W = Aw.shape
    M = np.einsum('xw,ij->iwxj', Aw, np.eye(Cin, dtype=np.float32))
    return np.ascontiguousarray(M.reshape(Cin * W, Wo * Cin))


def _height_upsample_shifted(Ah, N):
    """(3, N*Ho, N*H): dy-shifted (zero padded) height-interp, block-diag over N."""
    Ho, H = Ah.shape
    Apad = np.zeros((Ho + 2, H), np.float32)
    Apad[1:Ho + 1] = Ah
    eye_n = np.eye(N, dtype=np.float32)
    return np.stack([np.kron(eye_n, Apad[dy:dy + Ho]) for dy in range(3)])


def _shift_matrices(N, Ho):
    """(3, N*Ho, N*Ho): dy-shift (zero padded) of the conv1 activation rows."""
    Ipad = np.zeros((Ho + 2, Ho), np.float32)
    Ipad[1:Ho + 1] = np.eye(Ho, dtype=np.float32)
    eye_n = np.eye(N, dtype=np.float32)
    return np.stack([np.kron(eye_n, Ipad[dy:dy + Ho]) for dy in range(3)])


def _band_conv_weight(w, Wo):
    """PyTorch-layout w (Cout, Cin, 3, 3) -> (3, Wo*Cin, Wo*Cout) banded matrices.

    Wb[dy, (x+dx-1)*Cin + ci, x*Cout + co] = w[co, ci, dy, dx]  (dx taps clipped
    at the image border => implicit zero padding along width)."""
    w = np.asarray(w, dtype=np.float32)
    Cout, Cin, _, _ = w.shape
    Wb = np.zeros((3, Wo * Cin, Wo * Cout), np.float32)
    for dy in range(3):
        for dx in range(3):
            blk = w[:, :, dy, dx].T                      # (Cin, Cout)
            for x in range(Wo):
                xin = x + dx - 1
                if 0 <= xin < Wo:
                    Wb[dy, xin * Cin:(xin + 1) * Cin, x * Cout:(x + 1) * Cout] = blk
    return Wb


def _channel_pool_matrix(Wo, C):
    """(Wo*C, Wo*C) 0/1 matrix: P[x*C+c, x'*C+c'] = (c == c')."""
    return np.kron(np.ones((Wo, Wo), np.float32), np.eye(C, dtype=np.float32))


def _tile_channel(v, Wo):
    v = np.asarray(v, dtype=np.float32).reshape(-1)
    return np.tile(v, Wo).reshape(1, Wo * v.shape[0])


# ---------------------------------------------------------------------------
# Parameter init (synthetic, PyTorch weight layout) and forward builder.
# ---------------------------------------------------------------------------
def init_decoder_params(key, in_channels, channels, out_channels):
    k1, k2, k3, k4, k5, k6 = jax.random.split(key, 6)
    w1 = jax.random.normal(k1, (channels, in_channels, 3, 3), jnp.float32)
    w1 = w1 / np.sqrt(9 * in_channels)
    w2 = jax.random.normal(k2, (out_channels, channels, 3, 3), jnp.float32)
    w2 = w2 / np.sqrt(9 * channels)
    g1 = 1.0 + 0.1 * jax.random.normal(k3, (channels,), jnp.float32)
    b1 = 0.1 * jax.random.normal(k4, (channels,), jnp.float32)
    g2 = 1.0 + 0.1 * jax.random.normal(k5, (out_channels,), jnp.float32)
    b2 = 0.1 * jax.random.normal(k6, (out_channels,), jnp.float32)
    return dict(w1=w1, g1=g1, b1=b1, w2=w2, g2=g2, b2=b2)


def make_decoder(params, input_shape):
    """Returns a jitted fn: x (N, Cin, H, W) -> (N, Cout, 2H, 2W)."""
    N, Cin, H, W = input_shape
    C1 = int(params['w1'].shape[0])
    assert int(params['w1'].shape[1]) == Cin
    Cout = int(params['w2'].shape[0])
    Ho, Wo = 2 * H, 2 * W

    Ah = _interp_matrix(H, Ho)
    Aw = _interp_matrix(W, Wo)

    consts = dict(
        m1=_width_upsample_matrix(Aw, Cin),                       # (Cin*W, Wo*Cin)
        a1=_height_upsample_shifted(Ah, N),                       # (3, N*Ho, N*H)
        w1b=_band_conv_weight(params['w1'], Wo),                  # (3, Wo*Cin, Wo*C1)
        p1=_channel_pool_matrix(Wo, C1),                          # (Wo*C1, Wo*C1)
        g1=_tile_channel(params['g1'], Wo),                       # (1, Wo*C1)
        b1=_tile_channel(params['b1'], Wo),
        d2=_shift_matrices(N, Ho),                                # (3, N*Ho, N*Ho)
        w2b=_band_conv_weight(params['w2'], Wo),                  # (3, Wo*C1, Wo*Cout)
        p2=_channel_pool_matrix(Wo, Cout),                        # (Wo*Cout, Wo*Cout)
        g2=_tile_channel(params['g2'], Wo),                       # (1, Wo*Cout)
        b2=_tile_channel(params['b2'], Wo),
    )
    order = ['m1', 'a1', 'w1b', 'p1', 'g1', 'b1', 'd2', 'w2b', 'p2', 'g2', 'b2']
    const_args = tuple(jnp.asarray(consts[k]) for k in order)

    def full_spec(shape):
        nd = len(shape)
        return pl.BlockSpec(shape, lambda i, _nd=nd: (0,) * _nd)

    in_shapes = [(N * H, Cin * W)] + [consts[k].shape for k in order]
    out_shape2d = (N * Ho, Wo * Cout)

    kernel = functools.partial(_decoder_kernel,
                               inv_count=1.0 / float(N * Ho * Wo))
    call = pl.pallas_call(
        kernel,
        out_shape=jax.ShapeDtypeStruct(out_shape2d, jnp.float32),
        grid=(1,),
        in_specs=[full_spec(s) for s in in_shapes],
        out_specs=full_spec(out_shape2d),
        compiler_params=pltpu.CompilerParams(
            dimension_semantics=("arbitrary",)),
    )

    @jax.jit
    def fwd(x):
        # (N, Cin, H, W) -> rows (n, h), cols (ci, w); tiny (few-KB) input copy.
        xr = jnp.transpose(x, (0, 2, 1, 3)).reshape(N * H, Cin * W)
        o = call(xr, *const_args)                 # (N*Ho, Wo*Cout), lane-dense
        return o.reshape(N, Ho, Wo, Cout).transpose(0, 3, 1, 2)

    return fwd


# ---------------------------------------------------------------------------
# Pure-JAX reference (for correctness check only).
# ---------------------------------------------------------------------------
def _reference_decoder(x, params):
    N, Cin, H, W = x.shape
    Ah = jnp.asarray(_interp_matrix(H, 2 * H))
    Aw = jnp.asarray(_interp_matrix(W, 2 * W))
    xu = jnp.einsum('nchw,Hh,Ww->ncHW', x, Ah, Aw,
                    precision=lax.Precision.HIGHEST)

    def conv_bn_relu(z, w, g, b):
        o = lax.conv_general_dilated(
            z, w, (1, 1), ((1, 1), (1, 1)),
            dimension_numbers=('NCHW', 'OIHW', 'NCHW'),
            precision=lax.Precision.HIGHEST)
        mean = jnp.mean(o, axis=(0, 2, 3), keepdims=True)
        var = jnp.mean((o - mean) ** 2, axis=(0, 2, 3), keepdims=True)
        o = (o - mean) * lax.rsqrt(var + BN_EPS)
        o = o * g.reshape(1, -1, 1, 1) + b.reshape(1, -1, 1, 1)
        return jnp.maximum(o, 0.0)

    h = conv_bn_relu(xu, params['w1'], params['g1'], params['b1'])
    return conv_bn_relu(h, params['w2'], params['g2'], params['b2'])


if __name__ == "__main__":
    key = jax.random.PRNGKey(0)
    kx, kp = jax.random.split(key)

    # Decoder(in_channels=4, channels=8, out_channels=4) on a (2, 4, 16, 16) input.
    N, Cin, H, W = 2, 4, 16, 16
    channels, Cout = 8, 4

    x = jax.random.normal(kx, (N, Cin, H, W), jnp.float32)
    params = init_decoder_params(kp, Cin, channels, Cout)

    decoder = make_decoder(params, (N, Cin, H, W))
    y = decoder(x)
    jax.block_until_ready(y)

    assert y.shape == (N, Cout, 2 * H, 2 * W), y.shape
    assert bool(jnp.all(y >= 0.0))  # ReLU output

    y_ref = _reference_decoder(x, params)
    np.testing.assert_allclose(np.asarray(y), np.asarray(y_ref),
                               atol=3e-3, rtol=3e-3)
    print("KERNEL_OK")
</pallas_src>

<mosaic_0001>
module attributes {stable_mosaic.version = 11 : i64} {
  func.func @_decoder_kernel(%arg0: i32, %arg1: memref<32x64xf32, #tpu.memory_space<vmem>>, %arg2: memref<64x128xf32, #tpu.memory_space<vmem>>, %arg3: memref<3x64x32xf32, #tpu.memory_space<vmem>>, %arg4: memref<3x128x256xf32, #tpu.memory_space<vmem>>, %arg5: memref<256x256xf32, #tpu.memory_space<vmem>>, %arg6: memref<1x256xf32, #tpu.memory_space<vmem>>, %arg7: memref<1x256xf32, #tpu.memory_space<vmem>>, %arg8: memref<3x64x64xf32, #tpu.memory_space<vmem>>, %arg9: memref<3x256x128xf32, #tpu.memory_space<vmem>>, %arg10: memref<128x128xf32, #tpu.memory_space<vmem>>, %arg11: memref<1x128xf32, #tpu.memory_space<vmem>>, %arg12: memref<1x128xf32, #tpu.memory_space<vmem>>, %arg13: memref<64x128xf32, #tpu.memory_space<vmem>>) attributes {dimension_semantics = [#tpu.dimension_semantics<arbitrary>], iteration_bounds = array<i64: 1>, scalar_prefetch = 0 : i64, scratch_operands = 0 : i64, tpu.core_type = #tpu.core_type<tc>, window_params = [{pipeline_mode = #tpu.pipeline_mode<synchronous>, transform_indices = @transform_0, window_bounds = array<i64: 32, 64>}, {pipeline_mode = #tpu.pipeline_mode<synchronous>, transform_indices = @transform_1, window_bounds = array<i64: 64, 128>}, {pipeline_mode = #tpu.pipeline_mode<synchronous>, transform_indices = @transform_2, window_bounds = array<i64: 3, 64, 32>}, {pipeline_mode = #tpu.pipeline_mode<synchronous>, transform_indices = @transform_3, window_bounds = array<i64: 3, 128, 256>}, {pipeline_mode = #tpu.pipeline_mode<synchronous>, transform_indices = @transform_4, window_bounds = array<i64: 256, 256>}, {pipeline_mode = #tpu.pipeline_mode<synchronous>, transform_indices = @transform_5, window_bounds = array<i64: 1, 256>}, {pipeline_mode = #tpu.pipeline_mode<synchronous>, transform_indices = @transform_6, window_bounds = array<i64: 1, 256>}, {pipeline_mode = #tpu.pipeline_mode<synchronous>, transform_indices = @transform_7, window_bounds = array<i64: 3, 64, 64>}, {pipeline_mode = #tpu.pipeline_mode<synchronous>, transform_indices = @transform_8, window_bounds = array<i64: 3, 256, 128>}, {pipeline_mode = #tpu.pipeline_mode<synchronous>, transform_indices = @transform_9, window_bounds = array<i64: 128, 128>}, {pipeline_mode = #tpu.pipeline_mode<synchronous>, transform_indices = @transform_10, window_bounds = array<i64: 1, 128>}, {pipeline_mode = #tpu.pipeline_mode<synchronous>, transform_indices = @transform_11, window_bounds = array<i64: 1, 128>}, {pipeline_mode = #tpu.pipeline_mode<synchronous>, transform_indices = @transform_12, window_bounds = array<i64: 64, 128>}]} {
    %c0 = arith.constant 0 : index
    %c0_0 = arith.constant 0 : index
    %0 = vector.load %arg1[%c0, %c0_0] : memref<32x64xf32, #tpu.memory_space<vmem>>, vector<32x64xf32>
    %c0_1 = arith.constant 0 : index
    %c0_2 = arith.constant 0 : index
    %1 = vector.load %arg2[%c0_1, %c0_2] : memref<64x128xf32, #tpu.memory_space<vmem>>, vector<64x128xf32>
    %cst = arith.constant dense<0.000000e+00> : vector<32x128xf32>
    %2 = tpu.matmul %0, %1, %cst {dimension_numbers = #tpu.dot_dimension_numbers<[1], [0], [0], [1], [0, 0, 1, 1], [], []>} : vector<32x64xf32>, vector<64x128xf32>, vector<32x128xf32> -> vector<32x128xf32>
    %c0_3 = arith.constant 0 : index
    %c0_4 = arith.constant 0 : index
    %c0_5 = arith.constant 0 : index
    %3 = vector.load %arg3[%c0_3, %c0_4, %c0_5] : memref<3x64x32xf32, #tpu.memory_space<vmem>>, vector<1x64x32xf32>
    %4 = vector.shape_cast %3 : vector<1x64x32xf32> to vector<64x32xf32>
    %cst_6 = arith.constant dense<0.000000e+00> : vector<64x128xf32>
    %5 = tpu.matmul %4, %2, %cst_6 {dimension_numbers = #tpu.dot_dimension_numbers<[1], [0], [0], [1], [0, 0, 1, 1], [], []>} : vector<64x32xf32>, vector<32x128xf32>, vector<64x128xf32> -> vector<64x128xf32>
    %c0_7 = arith.constant 0 : index
    %c0_8 = arith.constant 0 : index
    %c0_9 = arith.constant 0 : index
    %6 = vector.load %arg4[%c0_7, %c0_8, %c0_9] : memref<3x128x256xf32, #tpu.memory_space<vmem>>, vector<1x128x256xf32>
    %7 = vector.shape_cast %6 : vector<1x128x256xf32> to vector<128x256xf32>
    %cst_10 = arith.constant dense<0.000000e+00> : vector<64x256xf32>
    %8 = tpu.matmul %5, %7, %cst_10 {dimension_numbers = #tpu.dot_dimension_numbers<[1], [0], [0], [1], [0, 0, 1, 1], [], []>} : vector<64x128xf32>, vector<128x256xf32>, vector<64x256xf32> -> vector<64x256xf32>
    %c1 = arith.constant 1 : index
    %c0_11 = arith.constant 0 : index
    %c0_12 = arith.constant 0 : index
    %9 = vector.load %arg3[%c1, %c0_11, %c0_12] : memref<3x64x32xf32, #tpu.memory_space<vmem>>, vector<1x64x32xf32>
    %10 = vector.shape_cast %9 : vector<1x64x32xf32> to vector<64x32xf32>
    %cst_13 = arith.constant dense<0.000000e+00> : vector<64x128xf32>
    %11 = tpu.matmul %10, %2, %cst_13 {dimension_numbers = #tpu.dot_dimension_numbers<[1], [0], [0], [1], [0, 0, 1, 1], [], []>} : vector<64x32xf32>, vector<32x128xf32>, vector<64x128xf32> -> vector<64x128xf32>
    %c1_14 = arith.constant 1 : index
    %c0_15 = arith.constant 0 : index
    %c0_16 = arith.constant 0 : index
    %12 = vector.load %arg4[%c1_14, %c0_15, %c0_16] : memref<3x128x256xf32, #tpu.memory_space<vmem>>, vector<1x128x256xf32>
    %13 = vector.shape_cast %12 : vector<1x128x256xf32> to vector<128x256xf32>
    %cst_17 = arith.constant dense<0.000000e+00> : vector<64x256xf32>
    %14 = tpu.matmul %11, %13, %cst_17 {dimension_numbers = #tpu.dot_dimension_numbers<[1], [0], [0], [1], [0, 0, 1, 1], [], []>} : vector<64x128xf32>, vector<128x256xf32>, vector<64x256xf32> -> vector<64x256xf32>
    %15 = arith.addf %8, %14 : vector<64x256xf32>
    %c2 = arith.constant 2 : index
    %c0_18 = arith.constant 0 : index
    %c0_19 = arith.constant 0 : index
    %16 = vector.load %arg3[%c2, %c0_18, %c0_19] : memref<3x64x32xf32, #tpu.memory_space<vmem>>, vector<1x64x32xf32>
    %17 = vector.shape_cast %16 : vector<1x64x32xf32> to vector<64x32xf32>
    %cst_20 = arith.constant dense<0.000000e+00> : vector<64x128xf32>
    %18 = tpu.matmul %17, %2, %cst_20 {dimension_numbers = #tpu.dot_dimension_numbers<[1], [0], [0], [1], [0, 0, 1, 1], [], []>} : vector<64x32xf32>, vector<32x128xf32>, vector<64x128xf32> -> vector<64x128xf32>
    %c2_21 = arith.constant 2 : index
    %c0_22 = arith.constant 0 : index
    %c0_23 = arith.constant 0 : index
    %19 = vector.load %arg4[%c2_21, %c0_22, %c0_23] : memref<3x128x256xf32, #tpu.memory_space<vmem>>, vector<1x128x256xf32>
    %20 = vector.shape_cast %19 : vector<1x128x256xf32> to vector<128x256xf32>
    %cst_24 = arith.constant dense<0.000000e+00> : vector<64x256xf32>
    %21 = tpu.matmul %18, %20, %cst_24 {dimension_numbers = #tpu.dot_dimension_numbers<[1], [0], [0], [1], [0, 0, 1, 1], [], []>} : vector<64x128xf32>, vector<128x256xf32>, vector<64x256xf32> -> vector<64x256xf32>
    %22 = arith.addf %15, %21 : vector<64x256xf32>
    %cst_25 = arith.constant dense<0.000000e+00> : vector<256xf32>
    %23 = vector.multi_reduction <add>, %22, %cst_25 [0] : vector<64x256xf32> to vector<256xf32>
    %24 = vector.shape_cast %23 : vector<256xf32> to vector<1x256xf32>
    %25 = arith.mulf %22, %22 : vector<64x256xf32>
    %cst_26 = arith.constant dense<0.000000e+00> : vector<256xf32>
    %26 = vector.multi_reduction <add>, %25, %cst_26 [0] : vector<64x256xf32> to vector<256xf32>
    %27 = vector.shape_cast %26 : vector<256xf32> to vector<1x256xf32>
    %c0_27 = arith.constant 0 : index
    %c0_28 = arith.constant 0 : index
    %28 = vector.load %arg5[%c0_27, %c0_28] : memref<256x256xf32, #tpu.memory_space<vmem>>, vector<256x256xf32>
    %cst_29 = arith.constant dense<0.000000e+00> : vector<1x256xf32>
    %29 = tpu.matmul %24, %28, %cst_29 {dimension_numbers = #tpu.dot_dimension_numbers<[1], [0], [0], [1], [0, 0, 1, 1], [], []>} : vector<1x256xf32>, vector<256x256xf32>, vector<1x256xf32> -> vector<1x256xf32>
    %c0_30 = arith.constant 0 : index
    %c0_31 = arith.constant 0 : index
    %30 = vector.load %arg5[%c0_30, %c0_31] : memref<256x256xf32, #tpu.memory_space<vmem>>, vector<256x256xf32>
    %cst_32 = arith.constant dense<0.000000e+00> : vector<1x256xf32>
    %31 = tpu.matmul %27, %30, %cst_32 {dimension_numbers = #tpu.dot_dimension_numbers<[1], [0], [0], [1], [0, 0, 1, 1], [], []>} : vector<1x256xf32>, vector<256x256xf32>, vector<1x256xf32> -> vector<1x256xf32>
    %cst_33 = arith.constant 4.8828125E-4 : f32
    %32 = vector.broadcast %cst_33 : f32 to vector<1x256xf32>
    %33 = arith.mulf %29, %32 : vector<1x256xf32>
    %cst_34 = arith.constant 4.8828125E-4 : f32
    %34 = vector.broadcast %cst_34 : f32 to vector<1x256xf32>
    %35 = arith.mulf %31, %34 : vector<1x256xf32>
    %36 = arith.mulf %33, %33 : vector<1x256xf32>
    %37 = arith.subf %35, %36 : vector<1x256xf32>
    %cst_35 = arith.constant 0.000000e+00 : f32
    %38 = vector.broadcast %cst_35 : f32 to vector<1x256xf32>
    %39 = arith.maximumf %37, %38 : vector<1x256xf32>
    %c0_36 = arith.constant 0 : index
    %c0_37 = arith.constant 0 : index
    %40 = vector.load %arg6[%c0_36, %c0_37] : memref<1x256xf32, #tpu.memory_space<vmem>>, vector<1x256xf32>
    %cst_38 = arith.constant 9.99999974E-6 : f32
    %41 = vector.broadcast %cst_38 : f32 to vector<1x256xf32>
    %42 = arith.addf %39, %41 : vector<1x256xf32>
    %43 = math.rsqrt %42 : vector<1x256xf32>
    %44 = arith.mulf %40, %43 : vector<1x256xf32>
    %c0_39 = arith.constant 0 : index
    %c0_40 = arith.constant 0 : index
    %45 = vector.load %arg7[%c0_39, %c0_40] : memref<1x256xf32, #tpu.memory_space<vmem>>, vector<1x256xf32>
    %46 = arith.mulf %33, %44 : vector<1x256xf32>
    %47 = arith.subf %45, %46 : vector<1x256xf32>
    %48 = vector.broadcast %44 : vector<1x256xf32> to vector<64x256xf32>
    %49 = arith.mulf %22, %48 : vector<64x256xf32>
    %50 = vector.broadcast %47 : vector<1x256xf32> to vector<64x256xf32>
    %51 = arith.addf %49, %50 : vector<64x256xf32>
    %cst_41 = arith.constant 0.000000e+00 : f32
    %52 = vector.broadcast %cst_41 : f32 to vector<64x256xf32>
    %53 = arith.maximumf %51, %52 : vector<64x256xf32>
    %c0_42 = arith.constant 0 : index
    %c0_43 = arith.constant 0 : index
    %c0_44 = arith.constant 0 : index
    %54 = vector.load %arg8[%c0_42, %c0_43, %c0_44] : memref<3x64x64xf32, #tpu.memory_space<vmem>>, vector<1x64x64xf32>
    %55 = vector.shape_cast %54 : vector<1x64x64xf32> to vector<64x64xf32>
    %cst_45 = arith.constant dense<0.000000e+00> : vector<64x256xf32>
    %56 = tpu.matmul %55, %53, %cst_45 {dimension_numbers = #tpu.dot_dimension_numbers<[1], [0], [0], [1], [0, 0, 1, 1], [], []>} : vector<64x64xf32>, vector<64x256xf32>, vector<64x256xf32> -> vector<64x256xf32>
    %c0_46 = arith.constant 0 : index
    %c0_47 = arith.constant 0 : index
    %c0_48 = arith.constant 0 : index
    %57 = vector.load %arg9[%c0_46, %c0_47, %c0_48] : memref<3x256x128xf32, #tpu.memory_space<vmem>>, vector<1x256x128xf32>
    %58 = vector.shape_cast %57 : vector<1x256x128xf32> to vector<256x128xf32>
    %cst_49 = arith.constant dense<0.000000e+00> : vector<64x128xf32>
    %59 = tpu.matmul %56, %58, %cst_49 {dimension_numbers = #tpu.dot_dimension_numbers<[1], [0], [0], [1], [0, 0, 1, 1], [], []>} : vector<64x256xf32>, vector<256x128xf32>, vector<64x128xf32> -> vector<64x128xf32>
    %c1_50 = arith.constant 1 : index
    %c0_51 = arith.constant 0 : index
    %c0_52 = arith.constant 0 : index
    %60 = vector.load %arg8[%c1_50, %c0_51, %c0_52] : memref<3x64x64xf32, #tpu.memory_space<vmem>>, vector<1x64x64xf32>
    %61 = vector.shape_cast %60 : vector<1x64x64xf32> to vector<64x64xf32>
    %cst_53 = arith.constant dense<0.000000e+00> : vector<64x256xf32>
    %62 = tpu.matmul %61, %53, %cst_53 {dimension_numbers = #tpu.dot_dimension_numbers<[1], [0], [0], [1], [0, 0, 1, 1], [], []>} : vector<64x64xf32>, vector<64x256xf32>, vector<64x256xf32> -> vector<64x256xf32>
    %c1_54 = arith.constant 1 : index
    %c0_55 = arith.constant 0 : index
    %c0_56 = arith.constant 0 : index
    %63 = vector.load %arg9[%c1_54, %c0_55, %c0_56] : memref<3x256x128xf32, #tpu.memory_space<vmem>>, vector<1x256x128xf32>
    %64 = vector.shape_cast %63 : vector<1x256x128xf32> to vector<256x128xf32>
    %cst_57 = arith.constant dense<0.000000e+00> : vector<64x128xf32>
    %65 = tpu.matmul %62, %64, %cst_57 {dimension_numbers = #tpu.dot_dimension_numbers<[1], [0], [0], [1], [0, 0, 1, 1], [], []>} : vector<64x256xf32>, vector<256x128xf32>, vector<64x128xf32> -> vector<64x128xf32>
    %66 = arith.addf %59, %65 : vector<64x128xf32>
    %c2_58 = arith.constant 2 : index
    %c0_59 = arith.constant 0 : index
    %c0_60 = arith.constant 0 : index
    %67 = vector.load %arg8[%c2_58, %c0_59, %c0_60] : memref<3x64x64xf32, #tpu.memory_space<vmem>>, vector<1x64x64xf32>
    %68 = vector.shape_cast %67 : vector<1x64x64xf32> to vector<64x64xf32>
    %cst_61 = arith.constant dense<0.000000e+00> : vector<64x256xf32>
    %69 = tpu.matmul %68, %53, %cst_61 {dimension_numbers = #tpu.dot_dimension_numbers<[1], [0], [0], [1], [0, 0, 1, 1], [], []>} : vector<64x64xf32>, vector<64x256xf32>, vector<64x256xf32> -> vector<64x256xf32>
    %c2_62 = arith.constant 2 : index
    %c0_63 = arith.constant 0 : index
    %c0_64 = arith.constant 0 : index
    %70 = vector.load %arg9[%c2_62, %c0_63, %c0_64] : memref<3x256x128xf32, #tpu.memory_space<vmem>>, vector<1x256x128xf32>
    %71 = vector.shape_cast %70 : vector<1x256x128xf32> to vector<256x128xf32>
    %cst_65 = arith.constant dense<0.000000e+00> : vector<64x128xf32>
    %72 = tpu.matmul %69, %71, %cst_65 {dimension_numbers = #tpu.dot_dimension_numbers<[1], [0], [0], [1], [0, 0, 1, 1], [], []>} : vector<64x256xf32>, vector<256x128xf32>, vector<64x128xf32> -> vector<64x128xf32>
    %73 = arith.addf %66, %72 : vector<64x128xf32>
    %cst_66 = arith.constant dense<0.000000e+00> : vector<128xf32>
    %74 = vector.multi_reduction <add>, %73, %cst_66 [0] : vector<64x128xf32> to vector<128xf32>
    %75 = vector.shape_cast %74 : vector<128xf32> to vector<1x128xf32>
    %76 = arith.mulf %73, %73 : vector<64x128xf32>
    %cst_67 = arith.constant dense<0.000000e+00> : vector<128xf32>
    %77 = vector.multi_reduction <add>, %76, %cst_67 [0] : vector<64x128xf32> to vector<128xf32>
    %78 = vector.shape_cast %77 : vector<128xf32> to vector<1x128xf32>
    %c0_68 = arith.constant 0 : index
    %c0_69 = arith.constant 0 : index
    %79 = vector.load %arg10[%c0_68, %c0_69] : memref<128x128xf32, #tpu.memory_space<vmem>>, vector<128x128xf32>
    %cst_70 = arith.constant dense<0.000000e+00> : vector<1x128xf32>
    %80 = tpu.matmul %75, %79, %cst_70 {dimension_numbers = #tpu.dot_dimension_numbers<[1], [0], [0], [1], [0, 0, 1, 1], [], []>} : vector<1x128xf32>, vector<128x128xf32>, vector<1x128xf32> -> vector<1x128xf32>
    %c0_71 = arith.constant 0 : index
    %c0_72 = arith.constant 0 : index
    %81 = vector.load %arg10[%c0_71, %c0_72] : memref<128x128xf32, #tpu.memory_space<vmem>>, vector<128x128xf32>
    %cst_73 = arith.constant dense<0.000000e+00> : vector<1x128xf32>
    %82 = tpu.matmul %78, %81, %cst_73 {dimension_numbers = #tpu.dot_dimension_numbers<[1], [0], [0], [1], [0, 0, 1, 1], [], []>} : vector<1x128xf32>, vector<128x128xf32>, vector<1x128xf32> -> vector<1x128xf32>
    %cst_74 = arith.constant 4.8828125E-4 : f32
    %83 = vector.broadcast %cst_74 : f32 to vector<1x128xf32>
    %84 = arith.mulf %80, %83 : vector<1x128xf32>
    %cst_75 = arith.constant 4.8828125E-4 : f32
    %85 = vector.broadcast %cst_75 : f32 to vector<1x128xf32>
    %86 = arith.mulf %82, %85 : vector<1x128xf32>
    %87 = arith.mulf %84, %84 : vector<1x128xf32>
    %88 = arith.subf %86, %87 : vector<1x128xf32>
    %cst_76 = arith.constant 0.000000e+00 : f32
    %89 = vector.broadcast %cst_76 : f32 to vector<1x128xf32>
    %90 = arith.maximumf %88, %89 : vector<1x128xf32>
    %c0_77 = arith.constant 0 : index
    %c0_78 = arith.constant 0 : index
    %91 = vector.load %arg11[%c0_77, %c0_78] : memref<1x128xf32, #tpu.memory_space<vmem>>, vector<1x128xf32>
    %cst_79 = arith.constant 9.99999974E-6 : f32
    %92 = vector.broadcast %cst_79 : f32 to vector<1x128xf32>
    %93 = arith.addf %90, %92 : vector<1x128xf32>
    %94 = math.rsqrt %93 : vector<1x128xf32>
    %95 = arith.mulf %91, %94 : vector<1x128xf32>
    %c0_80 = arith.constant 0 : index
    %c0_81 = arith.constant 0 : index
    %96 = vector.load %arg12[%c0_80, %c0_81] : memref<1x128xf32, #tpu.memory_space<vmem>>, vector<1x128xf32>
    %97 = arith.mulf %84, %95 : vector<1x128xf32>
    %98 = arith.subf %96, %97 : vector<1x128xf32>
    %99 = vector.broadcast %95 : vector<1x128xf32> to vector<64x128xf32>
    %100 = arith.mulf %73, %99 : vector<64x128xf32>
    %101 = vector.broadcast %98 : vector<1x128xf32> to vector<64x128xf32>
    %102 = arith.addf %100, %101 : vector<64x128xf32>
    %cst_82 = arith.constant 0.000000e+00 : f32
    %103 = vector.broadcast %cst_82 : f32 to vector<64x128xf32>
    %104 = arith.maximumf %102, %103 : vector<64x128xf32>
    %c0_83 = arith.constant 0 : index
    %c0_84 = arith.constant 0 : index
    %105 = vector.load %arg13[%c0_83, %c0_84] : memref<64x128xf32, #tpu.memory_space<vmem>>, vector<64x128xf32>
    tpu.vector_store %arg13[%c0_83, %c0_84], %104 {strides = array<i32>} : memref<64x128xf32, #tpu.memory_space<vmem>>, vector<64x128xf32>,
    return
  }
  func.func @transform_0(%arg0: i32) -> (i32, i32) {
    %c0_i32 = arith.constant 0 : i32
    %c0_i32_0 = arith.constant 0 : i32
    %c0_i32_1 = arith.constant 0 : i32
    return %c0_i32, %c0_i32_0 : i32, i32
  }
  func.func @transform_1(%arg0: i32) -> (i32, i32) {
    %c0_i32 = arith.constant 0 : i32
    %c0_i32_0 = arith.constant 0 : i32
    %c0_i32_1 = arith.constant 0 : i32
    return %c0_i32, %c0_i32_0 : i32, i32
  }
  func.func @transform_2(%arg0: i32) -> (i32, i32, i32) {
    %c0_i32 = arith.constant 0 : i32
    %c0_i32_0 = arith.constant 0 : i32
    %c0_i32_1 = arith.constant 0 : i32
    %c0_i32_2 = arith.constant 0 : i32
    return %c0_i32, %c0_i32_0, %c0_i32_1 : i32, i32, i32
  }
  func.func @transform_3(%arg0: i32) -> (i32, i32, i32) {
    %c0_i32 = arith.constant 0 : i32
    %c0_i32_0 = arith.constant 0 : i32
    %c0_i32_1 = arith.constant 0 : i32
    %c0_i32_2 = arith.constant 0 : i32
    return %c0_i32, %c0_i32_0, %c0_i32_1 : i32, i32, i32
  }
  func.func @transform_4(%arg0: i32) -> (i32, i32) {
    %c0_i32 = arith.constant 0 : i32
    %c0_i32_0 = arith.constant 0 : i32
    %c0_i32_1 = arith.constant 0 : i32
    return %c0_i32, %c0_i32_0 : i32, i32
  }
  func.func @transform_5(%arg0: i32) -> (i32, i32) {
    %c0_i32 = arith.constant 0 : i32
    %c0_i32_0 = arith.constant 0 : i32
    %c0_i32_1 = arith.constant 0 : i32
    return %c0_i32, %c0_i32_0 : i32, i32
  }
  func.func @transform_6(%arg0: i32) -> (i32, i32) {
    %c0_i32 = arith.constant 0 : i32
    %c0_i32_0 = arith.constant 0 : i32
    %c0_i32_1 = arith.constant 0 : i32
    return %c0_i32, %c0_i32_0 : i32, i32
  }
  func.func @transform_7(%arg0: i32) -> (i32, i32, i32) {
    %c0_i32 = arith.constant 0 : i32
    %c0_i32_0 = arith.constant 0 : i32
    %c0_i32_1 = arith.constant 0 : i32
    %c0_i32_2 = arith.constant 0 : i32
    return %c0_i32, %c0_i32_0, %c0_i32_1 : i32, i32, i32
  }
  func.func @transform_8(%arg0: i32) -> (i32, i32, i32) {
    %c0_i32 = arith.constant 0 : i32
    %c0_i32_0 = arith.constant 0 : i32
    %c0_i32_1 = arith.constant 0 : i32
    %c0_i32_2 = arith.constant 0 : i32
    return %c0_i32, %c0_i32_0, %c0_i32_1 : i32, i32, i32
  }
  func.func @transform_9(%arg0: i32) -> (i32, i32) {
    %c0_i32 = arith.constant 0 : i32
    %c0_i32_0 = arith.constant 0 : i32
    %c0_i32_1 = arith.constant 0 : i32
    return %c0_i32, %c0_i32_0 : i32, i32
  }
  func.func @transform_10(%arg0: i32) -> (i32, i32) {
    %c0_i32 = arith.constant 0 : i32
    %c0_i32_0 = arith.constant 0 : i32
    %c0_i32_1 = arith.constant 0 : i32
    return %c0_i32, %c0_i32_0 : i32, i32
  }
  func.func @transform_11(%arg0: i32) -> (i32, i32) {
    %c0_i32 = arith.constant 0 : i32
    %c0_i32_0 = arith.constant 0 : i32
    %c0_i32_1 = arith.constant 0 : i32
    return %c0_i32, %c0_i32_0 : i32, i32
  }
  func.func @transform_12(%arg0: i32) -> (i32, i32) {
    %c0_i32 = arith.constant 0 : i32
    %c0_i32_0 = arith.constant 0 : i32
    %c0_i32_1 = arith.constant 0 : i32
    return %c0_i32, %c0_i32_0 : i32, i32
  }
}

</mosaic_0001>

<bundles_post_ra>
// kernel: fwd.1
= control target key start
LH: loop header
LB: loop body
LE: loop exit
PB: predicated region body
PF: predicated region fallthrough
CT: control target
= control target key end

     0   :  { %17 = vsyncpa [#allocation3], 0  ;;  %s4520_s0 = inlined_call_operand.vmem [shape: f32[32,64], index: 0, kind: input, shape index: {}]   ;;  %s4521_s1 = inlined_call_operand.hbm [shape: f32[64,128], index: 1, kind: input, shape index: {}]   ;;  %s4522_s2 = inlined_call_operand.vmem [shape: f32[3,64,32], index: 2, kind: input, shape index: {}]   ;;  %s4523_s3 = inlined_call_operand.hbm [shape: f32[3,128,256], index: 3, kind: input, shape index: {}]   ;;  %s4524_s4 = inlined_call_operand.hbm [shape: f32[256,256], index: 4, kind: input, shape index: {}]   ;;  %s4525_s5 = inlined_call_operand.vmem [shape: f32[1,256], index: 5, kind: input, shape index: {}]   ;;  %s4526_s6 = inlined_call_operand.vmem [shape: f32[1,256], index: 6, kind: input, shape index: {}]   ;;  %s4527_s7 = inlined_call_operand.vmem [shape: f32[3,64,64], index: 7, kind: input, shape index: {}]   ;;  %s4528_s8 = inlined_call_operand.hbm [shape: f32[3,256,128], index: 8, kind: input, shape index: {}]   ;;  %s4529_s9 = inlined_call_operand.hbm [shape: f32[128,128], index: 9, kind: input, shape index: {}]   ;;  %s4530_s10 = inlined_call_operand.vmem [shape: f32[1,128], index: 10, kind: input, shape index: {}]   ;;  %s4531_s11 = inlined_call_operand.vmem [shape: f32[1,128], index: 11, kind: input, shape index: {}]   ;;  %s4532_s12 = inlined_call_operand.vmem [shape: f32[64,128], index: 12, kind: output, shape index: {}]  }
   0x1   :  { %18 = vsyncpa [#allocation5], 0 }
   0x2   :  { %19 = vsyncpa [#allocation8], 0  ;;  %s3706_s21 = smov [#allocation4]   ;;  %s3590_s25 = scalar_lea.hbm %s4523_s3, 12288 }
   0x3   :  { %s41_s22 = sshll.u32 %s3706_s21, 4  ;;  %p3591_p0 = scmp.ne.s32.totalorder %s4523_s3, %s3590_s25  ;;  %s42_s22 = int_to_ptr.vmem [resolvable:$true] %s41_s22 }
   0x4   :  { %p3594_p1 = scmp.lt.u32.totalorder %s3590_s25, %s4523_s3 }
   0x6   :  { %p3596_p2 = pnand %p3594_p1, %p3591_p0 }
   0x8   :  { %3599 = shalt.err (!%p3596_p2)
}
   0x9   :  { %s3600_s30 = scalar_lea.vmem %s42_s22, 12288  ;;  %p3605_p4 = scmp.lt.s32.totalorder %s42_s22, %s42_s22 }
   0xa   :  { %p3601_p3 = scmp.ne.s32.totalorder %s42_s22, %s3600_s30  ;;  %p3606_p5 = scmp.lt.s32.totalorder %s3600_s30, %s3600_s30 }
   0xc   :  { %p3607_p6 = por %p3606_p5, %p3605_p4 }
   0xe   :  { %p3608_p7 = pnand %p3607_p6, %p3601_p3 }
  0x10   :  { %3611 = shalt.err (!%p3608_p7)
}
  0x11   :  { %s3707_s13 = smov 256   ;;  %s3708_s14 = smov 16  }
  0x12   :  { %47 = dma.hbm_to_vmem [thread:$0]  %s4523_s3, 12288, %s42_s22, [#allocation5], %s3707_s13, %s3707_s13, %s3708_s14  }
  0x13   :  { %s3709_s17 = smov [#allocation7]   ;;  %s3710_s19 = smov [#allocation2]  }
  0x14   :  { %s71_s18 = sshll.u32 %s3709_s17, 4  ;;  %s27_s20 = sshll.u32 %s3710_s19, 4  ;;  %s72_s18 = int_to_ptr.vmem [resolvable:$true] %s71_s18  ;;  %s28_s20 = int_to_ptr.vmem [resolvable:$true] %s27_s20 }
  0x15   :  { %s3612_s24 = scalar_lea.hbm %s4528_s8, 12288 }
  0x16   :  { %p3613_p8 = scmp.ne.s32.totalorder %s4528_s8, %s3612_s24  ;;  %p3616_p9 = scmp.lt.u32.totalorder %s3612_s24, %s4528_s8 }
  0x18   :  { %p3618_p10 = pnand %p3616_p9, %p3613_p8 }
  0x1a   :  { %3621 = shalt.err (!%p3618_p10)
}
  0x1b   :  { %s3622_s3 = scalar_lea.vmem %s72_s18, 12288  ;;  %p3627_p12 = scmp.lt.s32.totalorder %s72_s18, %s72_s18 }
  0x1c   :  { %p3623_p11 = scmp.ne.s32.totalorder %s72_s18, %s3622_s3  ;;  %p3628_p13 = scmp.lt.s32.totalorder %s3622_s3, %s3622_s3 }
  0x1e   :  { %p3629_p0 = por %p3628_p13, %p3627_p12 }
  0x20   :  { %p3630_p1 = pnand %p3629_p0, %p3623_p11 }
  0x22   :  { %3633 = shalt.err (!%p3630_p1)
}
  0x23   :  { %s3711_s22 = smov 128   ;;  %s3712_s29 = smov 8  }
  0x24   :  { %77 = dma.hbm_to_vmem [thread:$0]  %s4528_s8, 12288, %s72_s18, [#allocation8], %s3711_s22, %s3711_s22, %s3712_s29  }
  0x25   :  { %s3634_s19 = scalar_lea.hbm %s4521_s1, 1024 }
  0x26   :  { %p3635_p2 = scmp.ne.s32.totalorder %s4521_s1, %s3634_s19  ;;  %p3638_p3 = scmp.lt.u32.totalorder %s3634_s19, %s4521_s1 }
  0x28   :  { %p3640_p4 = pnand %p3638_p3, %p3635_p2 }
  0x2a   :  { %3643 = shalt.err (!%p3640_p4)
}
  0x2b   :  { %s3644_s26 = scalar_lea.vmem %s28_s20, 1024  ;;  %p3649_p6 = scmp.lt.s32.totalorder %s28_s20, %s28_s20 }
  0x2c   :  { %p3645_p5 = scmp.ne.s32.totalorder %s28_s20, %s3644_s26  ;;  %p3650_p7 = scmp.lt.s32.totalorder %s3644_s26, %s3644_s26 }
  0x2e   :  { %p3651_p8 = por %p3650_p7, %p3649_p6 }
  0x30   :  { %p3652_p9 = pnand %p3651_p8, %p3645_p5 }
  0x32   :  { %3655 = shalt.err (!%p3652_p9)
}
  0x33   :  { %33 = dma.hbm_to_vmem [thread:$0]  %s4521_s1, 1024, %s28_s20, [#allocation3], %s3711_s22, %s3711_s22, %s3712_s29  }
  0x34   :  { %s3713_s27 = smov [#allocation6]   ;;  %s3714_s3 = smov [#allocation9]  }
  0x35   :  { %s53_s28 = sshll.u32 %s3713_s27, 4  ;;  %s83_s30 = sshll.u32 %s3714_s3, 4  ;;  %s54_s28 = int_to_ptr.vmem [resolvable:$true] %s53_s28  ;;  %s84_s30 = int_to_ptr.vmem [resolvable:$true] %s83_s30 }
  0x36   :  { %s3656_s17 = scalar_lea.hbm %s4524_s4, 8192 }
  0x37   :  { %p3657_p10 = scmp.ne.s32.totalorder %s4524_s4, %s3656_s17  ;;  %p3660_p11 = scmp.lt.u32.totalorder %s3656_s17, %s4524_s4 }
  0x39   :  { %p3662_p12 = pnand %p3660_p11, %p3657_p10 }
  0x3b   :  { %3665 = shalt.err (!%p3662_p12)
}
  0x3c   :  { %s3666_s1 = scalar_lea.vmem %s54_s28, 8192  ;;  %p3671_p0 = scmp.lt.s32.totalorder %s54_s28, %s54_s28 }
  0x3d   :  { %p3667_p13 = scmp.ne.s32.totalorder %s54_s28, %s3666_s1  ;;  %p3672_p1 = scmp.lt.s32.totalorder %s3666_s1, %s3666_s1 }
  0x3f   :  { %p3673_p2 = por %p3672_p1, %p3671_p0 }
  0x41   :  { %p3674_p3 = pnand %p3673_p2, %p3667_p13 }
  0x43   :  { %3677 = shalt.err (!%p3674_p3)
}
  0x44   :  { %59 = dma.hbm_to_vmem [thread:$0]  %s4524_s4, 8192, %s54_s28, [#allocation5], %s3707_s13, %s3707_s13, %s3708_s14  }
  0x45   :  { %s3678_s18 = scalar_lea.hbm %s4529_s9, 2048 }
  0x46   :  { %p3679_p4 = scmp.ne.s32.totalorder %s4529_s9, %s3678_s18  ;;  %p3682_p5 = scmp.lt.u32.totalorder %s3678_s18, %s4529_s9 }
  0x48   :  { %p3684_p6 = pnand %p3682_p5, %p3679_p4 }
  0x4a   :  { %3687 = shalt.err (!%p3684_p6)
}
  0x4b   :  { %s3688_s17 = scalar_lea.vmem %s84_s30, 2048  ;;  %p3693_p8 = scmp.lt.s32.totalorder %s84_s30, %s84_s30 }
  0x4c   :  { %p3689_p7 = scmp.ne.s32.totalorder %s84_s30, %s3688_s17  ;;  %p3694_p9 = scmp.lt.s32.totalorder %s3688_s17, %s3688_s17 }
  0x4e   :  { %p3695_p10 = por %p3694_p9, %p3693_p8 }
  0x50   :  { %p3696_p11 = pnand %p3695_p10, %p3689_p7 }
  0x52   :  { %3699 = shalt.err (!%p3696_p11)
}
  0x53   :  { %89 = dma.hbm_to_vmem [thread:$0]  %s4529_s9, 2048, %s84_s30, [#allocation8], %s3711_s22, %s3711_s22, %s3712_s29  }
  0x54   :  { %3700 = dma.done.wait [#allocation3], 1024  }
  0x55   :  { %3701 = vsyncadd [#allocation3], 4294966272 }
  0x56   :  { %3702 = dma.done.wait [#allocation5], 20480  }
  0x57   :  { %3703 = vsyncadd [#allocation5], 4294946816 }
  0x58   :  { %3704 = dma.done.wait [#allocation8], 14336  }
  0x59   :  { %3705 = vsyncadd [#allocation8], 4294952960  ;;  %v113_v0 = vld [vmem:[#allocation2] sm:$0xff]  ;;  %v114_v1 = vld [vmem:[#allocation2 + $0x8] sm:$0xff]  ;;  %vm121_vm0 = vcmask 523264   ;;  %vm227_vm1 = vcmask 261120  }
  0x5a   :  { %v115_v2 = vld [vmem:[#allocation2 + $0x10] sm:$0xff]  ;;  %v3083_v3 = vpack.c.bf16 %v114_v1, %v113_v0  ;;  %v116_v4 = vld [vmem:[#allocation2 + $0x18] sm:$0xff]  ;;  %v117_v6 = vld [vmem:[#allocation2 + $0x20] sm:$0xff]  ;;  %vm3718_vm2 = vmmov 0  }
  0x5b   :  { %v3087_v5 = vpack.c.bf16 %v116_v4, %v115_v2  ;;  %v118_v7 = vld [vmem:[#allocation2 + $0x28] sm:$0xff]  ;;  %v109_v8 = vld [vmem:[%s4520_s0] sm:$0xff]  ;;  %v119_v10 = vld [vmem:[#allocation2 + $0x30] sm:$0xff] }
  0x5c   :  { %3084 = vmatprep.subr.bf16.mxu0 %v3083_v3  ;;  %2947 = vmatprep.mubr.msk.f32.mxu0 %vm121_vm0, %v109_v8  ;;  %v3091_v9 = vpack.c.bf16 %v118_v7, %v117_v6  ;;  %v120_v11 = vld [vmem:[#allocation2 + $0x38] sm:$0xff]  ;;  %v110_v13 = vld [vmem:[%s4520_s0 + $0x8] sm:$0xff]  ;;  %v111_v14 = vld [vmem:[%s4520_s0 + $0x10] sm:$0xff] }
  0x5d   :  { %3086 = vmatpush3.bf16.msra.mxu0 %v3083_v3  ;;  %v3095_v12 = vpack.c.bf16 %v120_v11, %v119_v10  ;;  %v112_v15 = vld [vmem:[%s4520_s0 + $0x18] sm:$0xff]  ;;  %v2609_v16 = vld [vmem:[%s4522_s2 + $0x40] sm:$0xff]  ;;  %v529_v21 = vld [vmem:[#allocation4 + $0x108] sm:$0xff] }
  0x5e   :  { %3088 = vmatprep.subr.bf16.mxu0 %v3087_v5  ;;  %v219_v17 = vld [vmem:[%s4522_s2] sm:$0xff]  ;;  %v531_v22 = vld [vmem:[#allocation4 + $0x118] sm:$0xff]  ;;  %v530_v28 = vld [vmem:[#allocation4 + $0x110] sm:$0xff] }
  0x5f   :  { %2961 = vmatprep.mubr.msk.f32.mxu1 %vm227_vm1, %v219_v17  ;;  %v3115_v26 = vpack.c.bf16 %v531_v22, %v529_v21  ;;  %v528_v27 = vld [vmem:[#allocation4 + $0x100] sm:$0xff]  ;;  %v2610_v29 = vld [vmem:[%s4522_s2 + $0x48] sm:$0xff]  ;;  %v2611_v31 = vld [vmem:[%s4522_s2 + $0x50] sm:$0xff] }
  0x60   :  { %v220_v30 = vld [vmem:[%s4522_s2 + $0x8] sm:$0xff]  ;;  %v221_v32 = vld [vmem:[%s4522_s2 + $0x10] sm:$0xff]  ;;  %v3117_v33 = vpack.c.bf16 %v530_v28, %v528_v27  ;;  %v535_v35 = vld [vmem:[#allocation4 + $0x138] sm:$0xff] }
  0x61   :  { %3090 = vmatpush3.bf16.msra.mxu0 %v3087_v5  ;;  %v533_v34 = vld [vmem:[#allocation4 + $0x128] sm:$0xff]  ;;  %v532_v36 = vld [vmem:[#allocation4 + $0x120] sm:$0xff]  ;;  %v534_v37 = vld [vmem:[#allocation4 + $0x130] sm:$0xff] }
  0x62   :  { %3092 = vmatprep.subr.bf16.mxu0 %v3091_v9  ;;  %v2612_v38 = vld [vmem:[%s4522_s2 + $0x58] sm:$0xff]  ;;  %v2613_v40 = vld [vmem:[%s4522_s2 + $0x60] sm:$0xff]  ;;  %v3119_v41 = vpack.c.bf16 %v535_v35, %v533_v34  ;;  %v3121_v43 = vpack.c.bf16 %v534_v37, %v532_v36  ;;  %v537_v44 = vld [vmem:[#allocation4 + $0x148] sm:$0xff] }
  0x63   :  { %v222_v39 = vld [vmem:[%s4522_s2 + $0x18] sm:$0xff]  ;;  %v223_v42 = vld [vmem:[%s4522_s2 + $0x20] sm:$0xff]  ;;  %v538_v47 = vld [vmem:[#allocation4 + $0x150] sm:$0xff] }
  0x64   :  { %v539_v45 = vld [vmem:[#allocation4 + $0x158] sm:$0xff]  ;;  %v536_v46 = vld [vmem:[#allocation4 + $0x140] sm:$0xff]  ;;  %v2614_v48 = vld [vmem:[%s4522_s2 + $0x68] sm:$0xff] }
  0x65   :  { %3094 = vmatpush3.bf16.msra.mxu0 %v3091_v9  ;;  %v2615_v49 = vld [vmem:[%s4522_s2 + $0x70] sm:$0xff]  ;;  %v224_v50 = vld [vmem:[%s4522_s2 + $0x28] sm:$0xff]  ;;  %v3123_v52 = vpack.c.bf16 %v539_v45, %v537_v44  ;;  %v543_v54 = vld [vmem:[#allocation4 + $0x178] sm:$0xff]  ;;  %v3125_v55 = vpack.c.bf16 %v538_v47, %v536_v46 }
  0x66   :  { %3096 = vmatprep.subr.bf16.mxu0 %v3095_v12  ;;  %v225_v51 = vld [vmem:[%s4522_s2 + $0x30] sm:$0xff]  ;;  %v541_v53 = vld [vmem:[#allocation4 + $0x168] sm:$0xff]  ;;  %v2616_v56 = vld [vmem:[%s4522_s2 + $0x78] sm:$0xff] }
  0x67   :  { %v540_v57 = vld [vmem:[#allocation4 + $0x160] sm:$0xff]  ;;  %v542_v58 = vld [vmem:[#allocation4 + $0x170] sm:$0xff]  ;;  %v226_v59 = vld [vmem:[%s4522_s2 + $0x38] sm:$0xff]  ;;  %v3127_v60 = vpack.c.bf16 %v543_v54, %v541_v53 }
  0x68   :  { %v545_v61 = vld [vmem:[#allocation4 + $0x188] sm:$0xff]  ;;  %v547_v62 = vld [vmem:[#allocation4 + $0x198] sm:$0xff]  ;;  %v2625_v63 = vld [vmem:[%s4522_s2 + $0x80] sm:$0xff]  ;;  %v3129_v0 = vpack.c.bf16 %v542_v58, %v540_v57 }
  0x69   :  { %3098 = vmatpush3.bf16.msra.mxu0 %v3095_v12  ;;  %v3131_v1 = vpack.c.bf16 %v547_v62, %v545_v61  ;;  %v544_v2 = vld [vmem:[#allocation4 + $0x180] sm:$0xff]  ;;  %v546_v3 = vld [vmem:[#allocation4 + $0x190] sm:$0xff]  ;;  %v2626_v4 = vld [vmem:[%s4522_s2 + $0x88] sm:$0xff] }
  0x6a   :  { %v549_v5 = vld [vmem:[#allocation4 + $0x1a8] sm:$0xff]  ;;  %v551_v6 = vld [vmem:[#allocation4 + $0x1b8] sm:$0xff]  ;;  %v2627_v7 = vld [vmem:[%s4522_s2 + $0x90] sm:$0xff]  ;;  %v3133_v8 = vpack.c.bf16 %v546_v3, %v544_v2 }
  0x6b   :  { %v3135_v9 = vpack.c.bf16 %v551_v6, %v549_v5  ;;  %v548_v10 = vld [vmem:[#allocation4 + $0x1a0] sm:$0xff]  ;;  %v550_v11 = vld [vmem:[#allocation4 + $0x1b0] sm:$0xff]  ;;  %v2628_v12 = vld [vmem:[%s4522_s2 + $0x98] sm:$0xff] }
  0x6c   :  { %2948 = vmatmul.mubr.msk.f32.vlgmr.msra.gmra.mrb[0].mxu0 %vm121_vm0, %v110_v13  ;;  %v553_v13 = vld [vmem:[#allocation4 + $0x1c8] sm:$0xff]  ;;  %v559_v22 = vld [vmem:[#allocation4 + $0x1f8] sm:$0xff]  ;;  %v558_v27 = vld [vmem:[#allocation4 + $0x1f0] sm:$0xff] }
  0x6d   :  { %2950 = vmatprep.mubr.msk.f32.mxu0 %vm121_vm0, %v111_v14  ;;  %v555_v14 = vld [vmem:[#allocation4 + $0x1d8] sm:$0xff]  ;;  %v557_v21 = vld [vmem:[#allocation4 + $0x1e8] sm:$0xff]  ;;  %v1154_v36 = vld [vmem:[#allocation6] sm:$0xff] }
  0x6e   :  { %v3139_v17 = vpack.c.bf16 %v555_v14, %v553_v13  ;;  %v2632_v28 = vld [vmem:[%s4522_s2 + $0xb8] sm:$0xff]  ;;  %v1155_v34 = vld [vmem:[#allocation6 + $0x8] sm:$0xff]  ;;  %v1160_v44 = vld [vmem:[#allocation6 + $0x30] sm:$0xff] }
  0x6f   :  { %v1157_v35 = vld [vmem:[#allocation6 + $0x18] sm:$0xff]  ;;  %v1163_v45 = vld [vmem:[#allocation6 + $0x48] sm:$0xff]  ;;  %v1170_v61 = vld [vmem:[#allocation6 + $0x80] sm:$0xff] }
  0x70   :  { %2951 = vmatmul.mubr.msk.f32.gmra.mrb[2].mxu0 %vm121_vm0, %v112_v15  ;;  %v2629_v15 = vld [vmem:[%s4522_s2 + $0xa0] sm:$0xff]  ;;  %v3972_v37 = vpack.c.bf16 %v1157_v35, %v1155_v34  ;;  %v1165_v46 = vld [vmem:[#allocation6 + $0x58] sm:$0xff]  ;;  %v1171_v57 = vld [vmem:[#allocation6 + $0x88] sm:$0xff] }
  0x71   :  { %2981 = vmatprep.mubr.msk.f32.mxu0 %vm227_vm1, %v2609_v16  ;;  %v3137_v16 = vpack.c.bf16 %v550_v11, %v548_v10  ;;  %v1173_v58 = vld [vmem:[#allocation6 + $0x98] sm:$0xff]  ;;  %v1172_v62 = vld [vmem:[#allocation6 + $0x90] sm:$0xff]  ;;  %v362_v2 = vld [vmem:[#allocation4 + $0x28] sm:$0xff] }
  0x72   :  { %v364_v3 = vld [vmem:[#allocation4 + $0x38] sm:$0xff]  ;;  %v366_v11 = vld [vmem:[#allocation4 + $0x48] sm:$0xff] }
  0x73   :  { %v3151_v6 = vpack.c.bf16 %v364_v3, %v362_v2  ;;  %v383_v2 = vld [vmem:[#allocation4 + $0xd0] sm:$0xff] }
 0x13f   :  { %v2949_v18 = vpop.f32.mrb[0].mxu0 }
 0x140   :  { %v200_v19 = vpop.f32.mrb[1].mxu0 }
 0x141   :  { %v3099_v20 = vpack.c.bf16 %v2949_v18, %v200_v19  ;;  %v552_v18 = vld [vmem:[#allocation4 + $0x1c0] sm:$0xff]  ;;  %v554_v19 = vld [vmem:[#allocation4 + $0x1d0] sm:$0xff] }
 0x143   :  { %v2952_v23 = vpop.f32.mrb[2].mxu0  ;;  %3100 = vmatprep.subr.bf16.mxu1 %v3099_v20  ;;  %3108 = vmatprep.subr.bf16.mxu0 %v3099_v20 }
 0x144   :  { %v210_v24 = vpop.f32.mrb[3].mxu0  ;;  %3102 = vmatpush3.bf16.msra.mxu1 %v3099_v20  ;;  %3110 = vmatpush3.bf16.msra.mxu0 %v3099_v20 }
 0x145   :  { %v3103_v25 = vpack.c.bf16 %v2952_v23, %v210_v24  ;;  %v2631_v23 = vld [vmem:[%s4522_s2 + $0xb0] sm:$0xff]  ;;  %v3141_v24 = vpack.c.bf16 %v554_v19, %v552_v18 }
 0x146   :  { %v367_v18 = vld [vmem:[#allocation4 + $0x50] sm:$0xff] }
 0x147   :  { %3104 = vmatprep.subr.bf16.mxu1 %v3103_v25  ;;  %3112 = vmatprep.subr.bf16.mxu0 %v3103_v25 }
 0x148   :  { %3106 = vmatpush3.bf16.msra.mxu1 %v3103_v25  ;;  %3114 = vmatpush3.bf16.msra.mxu0 %v3103_v25 }
 0x149   :  { %3180 = vmatprep.subr.bf16.mxu0 %v3099_v20  ;;  %3116 = vmatprep.subr.bf16.mxu1 %v3115_v26  ;;  %v556_v26 = vld [vmem:[#allocation4 + $0x1e0] sm:$0xff] }
 0x14b   :  { %2982 = vmatmul.mubr.msk.f32.vlgmr.msra.gmra.mrb[4].mxu0 %vm227_vm1, %v2610_v29  ;;  %2962 = vmatmul.mubr.msk.f32.vlgmr.msra.gmra.mrb[0].mxu1 %vm227_vm1, %v220_v30  ;;  %v3145_v29 = vpack.c.bf16 %v558_v27, %v556_v26  ;;  %v358_v30 = vld [vmem:[#allocation4 + $0x8] sm:$0xff]  ;;  %v369_v27 = vld [vmem:[#allocation4 + $0x60] sm:$0xff] }
 0x14c   :  { %3182 = vmatpush3.bf16.msra.mxu0 %v3099_v20  ;;  %2984 = vmatprep.mubr.msk.f32.mxu0 %vm227_vm1, %v2611_v31  ;;  %v2630_v20 = vld [vmem:[%s4522_s2 + $0xa8] sm:$0xff]  ;;  %v360_v31 = vld [vmem:[#allocation4 + $0x18] sm:$0xff] }
 0x14d   :  { %3184 = vmatprep.subr.bf16.mxu0 %v3103_v25  ;;  %2964 = vmatprep.mubr.msk.f32.mxu1 %vm227_vm1, %v221_v32  ;;  %v3147_v32 = vpack.c.bf16 %v360_v31, %v358_v30  ;;  %v374_v31 = vld [vmem:[#allocation4 + $0x88] sm:$0xff] }
 0x14e   :  { %3118 = vmatpush1.bf16.msra.mxu1 %v3117_v33  ;;  %v4533_v33 = vmov 0.0  }
 0x14f   :  { %2985 = vmatmul.mubr.msk.f32.gmra.mrb[6].mxu0 %vm227_vm1, %v2612_v38  ;;  %2965 = vmatmul.mubr.msk.f32.gmra.mrb[2].mxu1 %vm227_vm1, %v222_v39  ;;  %v1156_v38 = vld [vmem:[#allocation6 + $0x10] sm:$0xff]  ;;  %v1159_v39 = vld [vmem:[#allocation6 + $0x28] sm:$0xff] }
 0x150   :  { %3186 = vmatpush3.bf16.msra.mxu0 %v3103_v25  ;;  %2987 = vmatprep.mubr.msk.f32.mxu0 %vm227_vm1, %v2613_v40  ;;  %v3143_v25 = vpack.c.bf16 %v559_v22, %v557_v21  ;;  %v1161_v40 = vld [vmem:[#allocation6 + $0x38] sm:$0xff]  ;;  %v370_v21 = vld [vmem:[#allocation4 + $0x68] sm:$0xff] }
 0x151   :  { %2967 = vmatprep.mubr.msk.f32.mxu1 %vm227_vm1, %v223_v42  ;;  %3120 = vmatprep.subr.bf16.mxu1 %v3119_v41  ;;  %v3974_v41 = vpack.c.bf16 %v1156_v38, %v1154_v36  ;;  %v3976_v42 = vpack.c.bf16 %v1161_v40, %v1159_v39  ;;  %v372_v22 = vld [vmem:[#allocation4 + $0x78] sm:$0xff]  ;;  %v373_v38 = vld [vmem:[#allocation4 + $0x80] sm:$0xff]  ;;  %v375_v39 = vld [vmem:[#allocation4 + $0x90] sm:$0xff] }
 0x152   :  { %3122 = vmatpush1.bf16.msra.mxu1 %v3121_v43  ;;  %v1158_v43 = vld [vmem:[#allocation6 + $0x20] sm:$0xff]  ;;  %3220 = vmatprep.subr.bf16.mxu0 %v3972_v37 }
 0x153   :  { %2988 = vmatmul.mubr.msk.f32.gmra.mrb[8].mxu0 %vm227_vm1, %v2614_v48  ;;  %2968 = vmatmul.mubr.msk.f32.gmra.mrb[4].mxu1 %vm227_vm1, %v224_v50  ;;  %v3980_v47 = vpack.c.bf16 %v1160_v44, %v1158_v43  ;;  %v3983_v48 = vpack.c.bf16 %v1165_v46, %v1163_v45  ;;  %v1164_v50 = vld [vmem:[#allocation6 + $0x50] sm:$0xff]  ;;  %v378_v44 = vld [vmem:[#allocation4 + $0xa8] sm:$0xff]  ;;  %v380_v45 = vld [vmem:[#allocation4 + $0xb8] sm:$0xff] }
 0x154   :  { %2990 = vmatprep.mubr.msk.f32.mxu0 %vm227_vm1, %v2615_v49  ;;  %2970 = vmatprep.mubr.msk.f32.mxu1 %vm227_vm1, %v225_v51  ;;  %v1162_v49 = vld [vmem:[#allocation6 + $0x40] sm:$0xff]  ;;  %v1167_v51 = vld [vmem:[#allocation6 + $0x68] sm:$0xff] }
 0x155   :  { %3124 = vmatprep.subr.bf16.mxu1 %v3123_v52  ;;  %v1169_v52 = vld [vmem:[#allocation6 + $0x78] sm:$0xff]  ;;  %v3986_v53 = vpack.c.bf16 %v1164_v50, %v1162_v49  ;;  %v3165_v50 = vpack.c.bf16 %v375_v39, %v373_v38  ;;  %v933_v39 = vld [vmem:[#allocation4 + $0x240] sm:$0xff] }
 0x156   :  { %3126 = vmatpush1.bf16.msra.mxu1 %v3125_v55  ;;  %v3989_v54 = vpack.c.bf16 %v1169_v52, %v1167_v51  ;;  %v1166_v55 = vld [vmem:[#allocation6 + $0x60] sm:$0xff]  ;;  %v3167_v51 = vpack.c.bf16 %v380_v45, %v378_v44  ;;  %v938_v44 = vld [vmem:[#allocation4 + $0x268] sm:$0xff]  ;;  %v940_v45 = vld [vmem:[#allocation4 + $0x278] sm:$0xff] }
 0x157   :  { %2991 = vmatmul.mubr.msk.f32.gmra.mrb[10].mxu0 %vm227_vm1, %v2616_v56  ;;  %2971 = vmatmul.mubr.msk.f32.gmra.mrb[6].mxu1 %vm227_vm1, %v226_v59  ;;  %v1168_v56 = vld [vmem:[#allocation6 + $0x70] sm:$0xff]  ;;  %v377_v52 = vld [vmem:[#allocation4 + $0xa0] sm:$0xff] }
 0x158   :  { %3001 = vmatprep.mubr.msk.f32.mxu0 %vm227_vm1, %v2625_v63  ;;  %3128 = vmatprep.subr.bf16.mxu1 %v3127_v60  ;;  %v3992_v59 = vpack.c.bf16 %v1168_v56, %v1166_v55  ;;  %v3995_v60 = vpack.c.bf16 %v1173_v58, %v1171_v57  ;;  %v3998_v63 = vpack.c.bf16 %v1172_v62, %v1170_v61  ;;  %v379_v55 = vld [vmem:[#allocation4 + $0xb0] sm:$0xff]  ;;  %v382_v57 = vld [vmem:[#allocation4 + $0xc8] sm:$0xff]  ;;  %v384_v58 = vld [vmem:[#allocation4 + $0xd8] sm:$0xff] }
 0x159   :  { %624 = vmatprep.mubr.f32.mxu1 %v4533_v33  ;;  %v3169_v62 = vpack.c.bf16 %v379_v55, %v377_v52  ;;  %v942_v52 = vld [vmem:[#allocation4 + $0x288] sm:$0xff]  ;;  %v944_v55 = vld [vmem:[#allocation4 + $0x298] sm:$0xff] }
 0x15a   :  { %3130 = vmatpush1.bf16.msra.mxu1 %v3129_v0  ;;  %v357_v0 = vld [vmem:[#allocation4] sm:$0xff] }
 0x15b   :  { %3002 = vmatmul.mubr.msk.f32.vlgmr.msra.gmra.mrb[12].mxu0 %vm227_vm1, %v2626_v4  ;;  %3132 = vmatprep.subr.bf16.mxu1 %v3131_v1  ;;  %v359_v1 = vld [vmem:[#allocation4 + $0x10] sm:$0xff] }
 0x15c   :  { %3004 = vmatprep.mubr.msk.f32.mxu0 %vm227_vm1, %v2627_v7  ;;  %3222 = vmatpush1.bf16.msra.mxu0 %v3974_v41  ;;  %v3149_v4 = vpack.c.bf16 %v359_v1, %v357_v0  ;;  %v361_v7 = vld [vmem:[#allocation4 + $0x20] sm:$0xff]  ;;  %v3171_v0 = vpack.c.bf16 %v384_v58, %v382_v57  ;;  %v3203_v58 = vpack.c.bf16 %v944_v55, %v942_v52  ;;  %v1192_v52 = vld [vmem:[#allocation6 + $0x130] sm:$0xff] }
 0x15d   :  { %3224 = vmatprep.subr.bf16.mxu0 %v3976_v42  ;;  %v381_v1 = vld [vmem:[#allocation4 + $0xc0] sm:$0xff] }
 0x15e   :  { %3134 = vmatpush1.bf16.msra.mxu1 %v3133_v8  ;;  %v363_v8 = vld [vmem:[#allocation4 + $0x30] sm:$0xff] }
 0x15f   :  { %3005 = vmatmul.mubr.msk.f32.gmra.mrb[14].mxu0 %vm227_vm1, %v2628_v12  ;;  %3136 = vmatprep.subr.bf16.mxu1 %v3135_v9  ;;  %v368_v12 = vld [vmem:[#allocation4 + $0x58] sm:$0xff]  ;;  %v3153_v14 = vpack.c.bf16 %v363_v8, %v361_v7  ;;  %v3173_v7 = vpack.c.bf16 %v383_v2, %v381_v1 }
 0x160   :  { %3007 = vmatprep.mubr.msk.f32.mxu0 %vm227_vm1, %v2629_v15  ;;  %3226 = vmatpush1.bf16.msra.mxu0 %v3980_v47  ;;  %v948_v1 = vld [vmem:[#allocation4 + $0x2b8] sm:$0xff] }
 0x161   :  { %3228 = vmatprep.subr.bf16.mxu0 %v3983_v48 }
 0x162   :  { %3138 = vmatpush1.bf16.msra.mxu1 %v3137_v16  ;;  %v3155_v16 = vpack.c.bf16 %v368_v12, %v366_v11  ;;  %v387_v11 = vld [vmem:[#allocation4 + $0xf0] sm:$0xff] }
 0x163   :  { %3008 = vmatmul.mubr.msk.f32.gmra.mrb[16].mxu0 %vm227_vm1, %v2630_v20  ;;  %3140 = vmatprep.subr.bf16.mxu1 %v3139_v17  ;;  %v365_v17 = vld [vmem:[#allocation4 + $0x40] sm:$0xff] }
 0x164   :  { %3010 = vmatprep.mubr.msk.f32.mxu0 %vm227_vm1, %v2631_v23  ;;  %3230 = vmatpush1.bf16.msra.mxu0 %v3986_v53 }
 0x165   :  { %3232 = vmatprep.subr.bf16.mxu0 %v3989_v54 }
 0x166   :  { %3142 = vmatpush1.bf16.msra.mxu1 %v3141_v24  ;;  %v3157_v24 = vpack.c.bf16 %v367_v18, %v365_v17 }
 0x167   :  { %3011 = vmatmul.mubr.msk.f32.gmra.mrb[18].mxu0 %vm227_vm1, %v2632_v28  ;;  %3144 = vmatprep.subr.bf16.mxu1 %v3143_v25  ;;  %v3159_v25 = vpack.c.bf16 %v372_v22, %v370_v21  ;;  %v371_v28 = vld [vmem:[#allocation4 + $0x70] sm:$0xff] }
 0x168   :  { %3234 = vmatpush1.bf16.msra.mxu0 %v3992_v59  ;;  %v3161_v35 = vpack.c.bf16 %v371_v28, %v369_v27  ;;  %v927_v21 = vld [vmem:[#allocation4 + $0x210] sm:$0xff] }
 0x169   :  { %3236 = vmatprep.subr.bf16.mxu0 %v3995_v60 }
 0x16a   :  { %3146 = vmatpush1.bf16.msra.mxu1 %v3145_v29 }
 0x16b   :  { %3148 = vmatprep.subr.bf16.mxu1 %v3147_v32  ;;  %v376_v32 = vld [vmem:[#allocation4 + $0x98] sm:$0xff] }
 0x16c   :  { %3238 = vmatpush1.bf16.msra.mxu0 %v3998_v63  ;;  %v3163_v36 = vpack.c.bf16 %v376_v32, %v374_v31  ;;  %v931_v31 = vld [vmem:[#allocation4 + $0x230] sm:$0xff]  ;;  %v934_v32 = vld [vmem:[#allocation4 + $0x248] sm:$0xff] }
 0x21e   :  { %v2983_v5 = vpop.f32.mrb[4].mxu0  ;;  %v4002_v9 = vpop.f32.mrb[0].mxu1 }
 0x21f   :  { %v488_v10 = vpop.f32.mrb[5].mxu0  ;;  %v4004_v13 = vpop.f32.mrb[1].mxu1 }
 0x220   :  { %625 = vmatmul.mubr.f32.vlgmr.msra.gmra.mrb[8].mxu1 %v488_v10  ;;  %v385_v10 = vld [vmem:[#allocation4 + $0xe0] sm:$0xff] }
 0x221   :  { %3150 = vmatpush1.bf16.msra.mxu1 %v3149_v4  ;;  %630 = vmatprep.mubr.f32.mxu1 %v4533_v33  ;;  %v386_v4 = vld [vmem:[#allocation4 + $0xe8] sm:$0xff]  ;;  %v3177_v17 = vpack.c.bf16 %v387_v11, %v385_v10 }
 0x222   :  { %3152 = vmatprep.subr.bf16.mxu1 %v3151_v6  ;;  %v2986_v15 = vpop.f32.mrb[6].mxu0  ;;  %v4007_v19 = vpop.f32.mrb[2].mxu1 }
 0x223   :  { %v498_v20 = vpop.f32.mrb[7].mxu0  ;;  %v4009_v23 = vpop.f32.mrb[3].mxu1 }
 0x224   :  { %631 = vmatmul.mubr.f32.gmra.mrb[10].mxu1 %v2983_v5  ;;  %v388_v5 = vld [vmem:[#allocation4 + $0xf8] sm:$0xff] }
 0x225   :  { %3154 = vmatpush1.bf16.msra.mxu1 %v3153_v14  ;;  %636 = vmatprep.mubr.f32.mxu1 %v4533_v33  ;;  %v3175_v8 = vpack.c.bf16 %v388_v5, %v386_v4  ;;  %v926_v14 = vld [vmem:[#allocation4 + $0x208] sm:$0xff]  ;;  %v945_v5 = vld [vmem:[#allocation4 + $0x2a0] sm:$0xff] }
 0x226   :  { %3156 = vmatprep.subr.bf16.mxu1 %v3155_v16  ;;  %v2989_v26 = vpop.f32.mrb[8].mxu0  ;;  %v4012_v29 = vpop.f32.mrb[4].mxu1 }
 0x227   :  { %v508_v30 = vpop.f32.mrb[9].mxu0  ;;  %v4014_v34 = vpop.f32.mrb[5].mxu1 }
 0x228   :  { %637 = vmatmul.mubr.f32.gmra.mrb[12].mxu1 %v498_v20  ;;  %v925_v20 = vld [vmem:[#allocation4 + $0x200] sm:$0xff] }
 0x229   :  { %3158 = vmatpush1.bf16.msra.mxu1 %v3157_v24  ;;  %642 = vmatprep.mubr.f32.mxu1 %v4533_v33  ;;  %v930_v24 = vld [vmem:[#allocation4 + $0x228] sm:$0xff]  ;;  %v3189_v27 = vpack.c.bf16 %v927_v21, %v925_v20  ;;  %v953_v21 = vld [vmem:[#allocation4 + $0x2e0] sm:$0xff] }
 0x22a   :  { %3160 = vmatprep.subr.bf16.mxu1 %v3159_v25  ;;  %v2992_v40 = vpop.f32.mrb[10].mxu0  ;;  %v4017_v43 = vpop.f32.mrb[6].mxu1  ;;  %v932_v25 = vld [vmem:[#allocation4 + $0x238] sm:$0xff] }
 0x22b   :  { %v518_v46 = vpop.f32.mrb[11].mxu0  ;;  %v4019_v49 = vpop.f32.mrb[7].mxu1  ;;  %v3191_v28 = vpack.c.bf16 %v932_v25, %v930_v24  ;;  %v1178_v25 = vld [vmem:[#allocation6 + $0xc0] sm:$0xff] }
 0x22c   :  { %643 = vmatmul.mubr.f32.gmra.mrb[14].mxu1 %v2986_v15  ;;  %v928_v15 = vld [vmem:[#allocation4 + $0x218] sm:$0xff] }
 0x22d   :  { %3162 = vmatpush1.bf16.msra.mxu1 %v3161_v35  ;;  %648 = vmatprep.mubr.f32.mxu1 %v4533_v33  ;;  %v3187_v18 = vpack.c.bf16 %v928_v15, %v926_v14  ;;  %v936_v35 = vld [vmem:[#allocation4 + $0x258] sm:$0xff]  ;;  %v949_v14 = vld [vmem:[#allocation4 + $0x2c0] sm:$0xff]  ;;  %v954_v15 = vld [vmem:[#allocation4 + $0x2e8] sm:$0xff] }
 0x22e   :  { %3164 = vmatprep.subr.bf16.mxu1 %v3163_v36  ;;  %v4022_v56 = vpop.f32.mrb[12].mxu0  ;;  %v3195_v38 = vpack.c.bf16 %v936_v35, %v934_v32  ;;  %v1184_v32 = vld [vmem:[#allocation6 + $0xf0] sm:$0xff] }
 0x22f   :  { %v4024_v61 = vpop.f32.mrb[13].mxu0 }
 0x230   :  { %649 = vmatmul.mubr.f32.gmra.mrb[16].mxu1 %v508_v30  ;;  %v929_v30 = vld [vmem:[#allocation4 + $0x220] sm:$0xff] }
 0x231   :  { %3166 = vmatpush1.bf16.msra.mxu1 %v3165_v50  ;;  %654 = vmatprep.mubr.f32.mxu1 %v4533_v33  ;;  %v3193_v36 = vpack.c.bf16 %v931_v31, %v929_v30  ;;  %v3199_v50 = vpack.c.bf16 %v940_v45, %v938_v44  ;;  %v1182_v31 = vld [vmem:[#allocation6 + $0xe0] sm:$0xff]  ;;  %v1188_v44 = vld [vmem:[#allocation6 + $0x110] sm:$0xff] }
 0x232   :  { %3168 = vmatprep.subr.bf16.mxu1 %v3167_v51  ;;  %v4027_v3 = vpop.f32.mrb[14].mxu0  ;;  %v937_v51 = vld [vmem:[#allocation4 + $0x260] sm:$0xff]  ;;  %v4088_v35 = vpack.c.bf16 %v1184_v32, %v1182_v31  ;;  %v1216_v32 = vld [vmem:[#allocation6 + $0x1f0] sm:$0xff] }
 0x233   :  { %v4029_v6 = vpop.f32.mrb[15].mxu0  ;;  %v1214_v31 = vld [vmem:[#allocation6 + $0x1e0] sm:$0xff] }
 0x234   :  { %655 = vmatmul.mubr.f32.gmra.mrb[18].mxu1 %v2989_v26 }
 0x235   :  { %3170 = vmatpush1.bf16.msra.mxu1 %v3169_v62  ;;  %660 = vmatprep.mubr.f32.mxu1 %v4533_v33  ;;  %v941_v62 = vld [vmem:[#allocation4 + $0x280] sm:$0xff] }
 0x236   :  { %3172 = vmatprep.subr.bf16.mxu1 %v3171_v0  ;;  %v4032_v12 = vpop.f32.mrb[16].mxu0  ;;  %v946_v0 = vld [vmem:[#allocation4 + $0x2a8] sm:$0xff] }
 0x237   :  { %v4034_v16 = vpop.f32.mrb[17].mxu0  ;;  %v3207_v4 = vpack.c.bf16 %v948_v1, %v946_v0  ;;  %v1196_v0 = vld [vmem:[#allocation6 + $0x150] sm:$0xff] }
 0x238   :  { %661 = vmatmul.mubr.f32.gmra.mrb[20].mxu1 %v518_v46 }
 0x239   :  { %3174 = vmatpush1.bf16.msra.mxu1 %v3173_v7  ;;  %666 = vmatprep.mubr.f32.mxu1 %v4533_v33  ;;  %v950_v7 = vld [vmem:[#allocation4 + $0x2c8] sm:$0xff] }
 0x23a   :  { %3176 = vmatprep.subr.bf16.mxu1 %v3175_v8  ;;  %v4037_v22 = vpop.f32.mrb[18].mxu0  ;;  %v952_v8 = vld [vmem:[#allocation4 + $0x2d8] sm:$0xff] }
 0x23b   :  { %v4039_v26 = vpop.f32.mrb[19].mxu0  ;;  %v3211_v11 = vpack.c.bf16 %v952_v8, %v950_v7  ;;  %v1200_v7 = vld [vmem:[#allocation6 + $0x170] sm:$0xff] }
 0x23c   :  { %667 = vmatmul.mubr.f32.gmra.mrb[22].mxu1 %v2992_v40  ;;  %v935_v40 = vld [vmem:[#allocation4 + $0x250] sm:$0xff] }
 0x23d   :  { %3178 = vmatpush1.bf16.msra.mxu1 %v3177_v17  ;;  %737 = vmatprep.mubr.f32.mxu1 %v4533_v33  ;;  %v3197_v46 = vpack.c.bf16 %v935_v40, %v933_v39  ;;  %v956_v17 = vld [vmem:[#allocation4 + $0x2f8] sm:$0xff]  ;;  %v1186_v40 = vld [vmem:[#allocation6 + $0x100] sm:$0xff] }
 0x23e   :  { %3188 = vmatprep.subr.bf16.mxu1 %v3187_v18  ;;  %v3215_v20 = vpack.c.bf16 %v956_v17, %v954_v15  ;;  %v4094_v45 = vpack.c.bf16 %v1188_v44, %v1186_v40  ;;  %v1204_v15 = vld [vmem:[#allocation6 + $0x190] sm:$0xff] }
 0x240   :  { %738 = vmatmul.mubr.f32.vlgmr.msra.gmra.mrb[8].mxu1 %v4004_v13  ;;  %v939_v13 = vld [vmem:[#allocation4 + $0x270] sm:$0xff] }
 0x241   :  { %3190 = vmatpush1.bf16.msra.mxu1 %v3189_v27  ;;  %743 = vmatprep.mubr.f32.mxu1 %v4533_v33  ;;  %v3201_v57 = vpack.c.bf16 %v939_v13, %v937_v51  ;;  %v1183_v27 = vld [vmem:[#allocation6 + $0xe8] sm:$0xff]  ;;  %v1190_v13 = vld [vmem:[#allocation6 + $0x120] sm:$0xff] }
 0x242   :  { %3192 = vmatprep.subr.bf16.mxu1 %v3191_v28  ;;  %v1185_v28 = vld [vmem:[#allocation6 + $0xf8] sm:$0xff]  ;;  %v4100_v55 = vpack.c.bf16 %v1192_v52, %v1190_v13 }
 0x243   :  { %v4086_v30 = vpack.c.bf16 %v1185_v28, %v1183_v27  ;;  %v1217_v27 = vld [vmem:[#allocation6 + $0x1f8] sm:$0xff] }
 0x244   :  { %744 = vmatmul.mubr.f32.gmra.mrb[10].mxu1 %v4002_v9  ;;  %v943_v9 = vld [vmem:[#allocation4 + $0x290] sm:$0xff] }
 0x245   :  { %3194 = vmatpush1.bf16.msra.mxu1 %v3193_v36  ;;  %749 = vmatprep.mubr.f32.mxu1 %v4533_v33  ;;  %v3205_v2 = vpack.c.bf16 %v943_v9, %v941_v62  ;;  %v1187_v36 = vld [vmem:[#allocation6 + $0x108] sm:$0xff]  ;;  %v1194_v9 = vld [vmem:[#allocation6 + $0x140] sm:$0xff] }
 0x246   :  { %3196 = vmatprep.subr.bf16.mxu1 %v3195_v38  ;;  %v1189_v38 = vld [vmem:[#allocation6 + $0x118] sm:$0xff]  ;;  %v4106_v1 = vpack.c.bf16 %v1196_v0, %v1194_v9 }
 0x247   :  { %v4092_v39 = vpack.c.bf16 %v1189_v38, %v1187_v36  ;;  %v4136_v36 = vpack.c.bf16 %v1216_v32, %v1214_v31 }
 0x248   :  { %750 = vmatmul.mubr.f32.gmra.mrb[12].mxu1 %v4009_v23  ;;  %v947_v23 = vld [vmem:[#allocation4 + $0x2b0] sm:$0xff] }
 0x249   :  { %3198 = vmatpush1.bf16.msra.mxu1 %v3197_v46  ;;  %755 = vmatprep.mubr.f32.mxu1 %v4533_v33  ;;  %v3209_v10 = vpack.c.bf16 %v947_v23, %v945_v5  ;;  %v1191_v46 = vld [vmem:[#allocation6 + $0x128] sm:$0xff]  ;;  %v1198_v23 = vld [vmem:[#allocation6 + $0x160] sm:$0xff] }
 0x24a   :  { %3200 = vmatprep.subr.bf16.mxu1 %v3199_v50  ;;  %v1193_v50 = vld [vmem:[#allocation6 + $0x138] sm:$0xff]  ;;  %v4112_v8 = vpack.c.bf16 %v1200_v7, %v1198_v23 }
 0x24b   :  { %v4098_v51 = vpack.c.bf16 %v1193_v50, %v1191_v46 }
 0x24c   :  { %756 = vmatmul.mubr.f32.gmra.mrb[14].mxu1 %v4007_v19  ;;  %v951_v19 = vld [vmem:[#allocation4 + $0x2d0] sm:$0xff] }
 0x24d   :  { %3202 = vmatpush1.bf16.msra.mxu1 %v3201_v57  ;;  %761 = vmatprep.mubr.f32.mxu1 %v4533_v33  ;;  %v3213_v18 = vpack.c.bf16 %v951_v19, %v949_v14  ;;  %v1195_v57 = vld [vmem:[#allocation6 + $0x148] sm:$0xff]  ;;  %v1202_v19 = vld [vmem:[#allocation6 + $0x180] sm:$0xff] }
 0x24e   :  { %3204 = vmatprep.subr.bf16.mxu1 %v3203_v58  ;;  %v1197_v58 = vld [vmem:[#allocation6 + $0x158] sm:$0xff]  ;;  %v4118_v17 = vpack.c.bf16 %v1204_v15, %v1202_v19 }
 0x24f   :  { %v4104_v62 = vpack.c.bf16 %v1197_v58, %v1195_v57 }
 0x250   :  { %762 = vmatmul.mubr.f32.gmra.mrb[16].mxu1 %v4014_v34  ;;  %v955_v34 = vld [vmem:[#allocation4 + $0x2f0] sm:$0xff] }
 0x251   :  { %3206 = vmatpush1.bf16.msra.mxu1 %v3205_v2  ;;  %767 = vmatprep.mubr.f32.mxu1 %v4533_v33  ;;  %v3217_v24 = vpack.c.bf16 %v955_v34, %v953_v21  ;;  %v1199_v2 = vld [vmem:[#allocation6 + $0x168] sm:$0xff]  ;;  %v1206_v34 = vld [vmem:[#allocation6 + $0x1a0] sm:$0xff] }
 0x252   :  { %3208 = vmatprep.subr.bf16.mxu1 %v3207_v4  ;;  %v1201_v4 = vld [vmem:[#allocation6 + $0x178] sm:$0xff] }
 0x253   :  { %v4110_v5 = vpack.c.bf16 %v1201_v4, %v1199_v2 }
 0x254   :  { %768 = vmatmul.mubr.f32.gmra.mrb[18].mxu1 %v4012_v29  ;;  %v1175_v29 = vld [vmem:[#allocation6 + $0xa8] sm:$0xff] }
 0x255   :  { %3210 = vmatpush1.bf16.msra.mxu1 %v3209_v10  ;;  %773 = vmatprep.mubr.f32.mxu1 %v4533_v33  ;;  %v1203_v10 = vld [vmem:[#allocation6 + $0x188] sm:$0xff] }
 0x256   :  { %3212 = vmatprep.subr.bf16.mxu1 %v3211_v11  ;;  %v1205_v11 = vld [vmem:[#allocation6 + $0x198] sm:$0xff] }
 0x257   :  { %v4116_v14 = vpack.c.bf16 %v1205_v11, %v1203_v10 }
 0x258   :  { %774 = vmatmul.mubr.f32.gmra.mrb[20].mxu1 %v4019_v49 }
 0x259   :  { %3214 = vmatpush1.bf16.msra.mxu1 %v3213_v18  ;;  %779 = vmatprep.mubr.f32.mxu1 %v4533_v33  ;;  %v1207_v18 = vld [vmem:[#allocation6 + $0x1a8] sm:$0xff] }
 0x25a   :  { %3216 = vmatprep.subr.bf16.mxu1 %v3215_v20  ;;  %v1209_v20 = vld [vmem:[#allocation6 + $0x1b8] sm:$0xff] }
 0x25b   :  { %v4122_v21 = vpack.c.bf16 %v1209_v20, %v1207_v18 }
 0x25c   :  { %780 = vmatmul.mubr.f32.gmra.mrb[22].mxu1 %v4017_v43  ;;  %v1177_v43 = vld [vmem:[#allocation6 + $0xb8] sm:$0xff] }
 0x25d   :  { %3218 = vmatpush1.bf16.msra.mxu1 %v3217_v24  ;;  %1021 = vmatprep.mubr.f32.mxu1 %v4533_v33  ;;  %v4074_v49 = vpack.c.bf16 %v1177_v43, %v1175_v29  ;;  %v1208_v24 = vld [vmem:[#allocation6 + $0x1b0] sm:$0xff]  ;;  %v1211_v43 = vld [vmem:[#allocation6 + $0x1c8] sm:$0xff] }
 0x25e   :  { %v4124_v29 = vpack.c.bf16 %v1208_v24, %v1206_v34 }
 0x25f   :  { %3240 = vmatprep.subr.bf16.mxu0 %v4074_v49 }
 0x260   :  { %1022 = vmatmul.mubr.f32.vlgmr.msra.gmra.mrb[8].mxu1 %v4024_v61  ;;  %v1176_v61 = vld [vmem:[#allocation6 + $0xb0] sm:$0xff] }
 0x261   :  { %1027 = vmatprep.mubr.f32.mxu1 %v4533_v33 }
 0x264   :  { %1028 = vmatmul.mubr.f32.gmra.mrb[10].mxu1 %v4022_v56  ;;  %v1174_v56 = vld [vmem:[#allocation6 + $0xa0] sm:$0xff] }
 0x265   :  { %1033 = vmatprep.mubr.f32.mxu1 %v4533_v33 }
 0x268   :  { %1034 = vmatmul.mubr.f32.gmra.mrb[12].mxu1 %v4029_v6  ;;  %v1179_v6 = vld [vmem:[#allocation6 + $0xc8] sm:$0xff] }
 0x269   :  { %1039 = vmatprep.mubr.f32.mxu1 %v4533_v33 }
 0x26c   :  { %1040 = vmatmul.mubr.f32.gmra.mrb[14].mxu1 %v4027_v3  ;;  %v4076_v3 = vpack.c.bf16 %v1176_v61, %v1174_v56  ;;  %v1213_v56 = vld [vmem:[#allocation6 + $0x1d8] sm:$0xff] }
 0x26d   :  { %1045 = vmatprep.mubr.f32.mxu1 %v4533_v33  ;;  %v4128_v61 = vpack.c.bf16 %v1213_v56, %v1211_v43 }
 0x26e   :  { %3242 = vmatpush1.bf16.msra.mxu0 %v4076_v3 }
 0x270   :  { %1046 = vmatmul.mubr.f32.gmra.mrb[16].mxu1 %v4034_v16 }
 0x271   :  { %1051 = vmatprep.mubr.f32.mxu1 %v4533_v33 }
 0x274   :  { %1052 = vmatmul.mubr.f32.gmra.mrb[18].mxu1 %v4032_v12  ;;  %v1181_v12 = vld [vmem:[#allocation6 + $0xd8] sm:$0xff] }
 0x275   :  { %1057 = vmatprep.mubr.f32.mxu1 %v4533_v33  ;;  %v4080_v16 = vpack.c.bf16 %v1181_v12, %v1179_v6  ;;  %v1210_v6 = vld [vmem:[#allocation6 + $0x1c0] sm:$0xff]  ;;  %v1212_v12 = vld [vmem:[#allocation6 + $0x1d0] sm:$0xff] }
 0x277   :  { %3244 = vmatprep.subr.bf16.mxu0 %v4080_v16 }
 0x278   :  { %1058 = vmatmul.mubr.f32.gmra.mrb[20].mxu1 %v4039_v26 }
 0x279   :  { %1063 = vmatprep.mubr.f32.mxu1 %v4533_v33 }
 0x27c   :  { %1064 = vmatmul.mubr.f32.gmra.mrb[22].mxu1 %v4037_v22  ;;  %v1180_v22 = vld [vmem:[#allocation6 + $0xd0] sm:$0xff] }
 0x27d   :  { %1582 = vmatprep.mubr.f32.mxu1 %v4533_v33  ;;  %v4082_v26 = vpack.c.bf16 %v1180_v22, %v1178_v25  ;;  %v4130_v25 = vpack.c.bf16 %v1212_v12, %v1210_v6  ;;  %v1215_v22 = vld [vmem:[#allocation6 + $0x1e8] sm:$0xff] }
 0x27e   :  { %v4134_v28 = vpack.c.bf16 %v1217_v27, %v1215_v22 }
 0x27f   :  { %3246 = vmatpush1.bf16.msra.mxu0 %v4082_v26 }
 0x280   :  { %3248 = vmatprep.subr.bf16.mxu0 %v4086_v30 }
 0x283   :  { %3250 = vmatpush1.bf16.msra.mxu0 %v4088_v35 }
 0x284   :  { %3252 = vmatprep.subr.bf16.mxu0 %v4092_v39 }
 0x287   :  { %3254 = vmatpush1.bf16.msra.mxu0 %v4094_v45 }
 0x288   :  { %3256 = vmatprep.subr.bf16.mxu0 %v4098_v51 }
 0x28b   :  { %3258 = vmatpush1.bf16.msra.mxu0 %v4100_v55 }
 0x28c   :  { %3260 = vmatprep.subr.bf16.mxu0 %v4104_v62 }
 0x28f   :  { %3262 = vmatpush1.bf16.msra.mxu0 %v4106_v1 }
 0x290   :  { %3264 = vmatprep.subr.bf16.mxu0 %v4110_v5 }
 0x293   :  { %3266 = vmatpush1.bf16.msra.mxu0 %v4112_v8 }
 0x294   :  { %3268 = vmatprep.subr.bf16.mxu0 %v4116_v14 }
 0x297   :  { %3270 = vmatpush1.bf16.msra.mxu0 %v4118_v17 }
 0x298   :  { %3272 = vmatprep.subr.bf16.mxu0 %v4122_v21 }
 0x29b   :  { %3274 = vmatpush1.bf16.msra.mxu0 %v4124_v29 }
 0x29c   :  { %3276 = vmatprep.subr.bf16.mxu0 %v4128_v61 }
 0x29f   :  { %3278 = vmatpush1.bf16.msra.mxu0 %v4130_v25 }
 0x2a0   :  { %3280 = vmatprep.subr.bf16.mxu0 %v4134_v28 }
 0x2a3   :  { %3282 = vmatpush1.bf16.msra.mxu0 %v4136_v36 }
 0x2a4   :  { %3284 = vmatprep.subr.bf16.mxu0 %v3972_v37 }
 0x333   :  { %v4141_v38 = vpop.f32.mrb[8].mxu1 }
 0x334   :  { %v4143_v40 = vpop.f32.mrb[9].mxu1  ;;  %v1112_v46 = vmul.f32 %v4141_v38, %v4141_v38 }
 0x335   :  { %v1113_v37 = vmul.f32 %v4143_v40, %v4143_v40 }
 0x337   :  { %v4145_v44 = vpop.f32.mrb[10].mxu1 }
 0x338   :  { %v1086_v50 = vadd.f32 %v4145_v44, %v4141_v38  ;;  %v1114_v13 = vmul.f32 %v4145_v44, %v4145_v44  ;;  %v4153_v52 = vpop.f32.mrb[11].mxu1 }
 0x339   :  { %v1099_v57 = vadd.f32 %v4153_v52, %v4143_v40  ;;  %v1115_v58 = vmul.f32 %v4153_v52, %v4153_v52 }
 0x33a   :  { %v1128_v9 = vadd.f32 %v1114_v13, %v1112_v46 }
 0x33b   :  { %v1141_v0 = vadd.f32 %v1115_v58, %v1113_v37  ;;  %v4161_v2 = vpop.f32.mrb[12].mxu1 }
 0x33c   :  { %v1087_v4 = vadd.f32 %v1086_v50, %v4161_v2  ;;  %v1116_v23 = vmul.f32 %v4161_v2, %v4161_v2  ;;  %v4166_v7 = vpop.f32.mrb[13].mxu1 }
 0x33d   :  { %v1100_v10 = vadd.f32 %v1099_v57, %v4166_v7  ;;  %v1117_v11 = vmul.f32 %v4166_v7, %v4166_v7 }
 0x33e   :  { %v1129_v19 = vadd.f32 %v1128_v9, %v1116_v23 }
 0x33f   :  { %v1142_v15 = vadd.f32 %v1141_v0, %v1117_v11  ;;  %v4171_v18 = vpop.f32.mrb[14].mxu1 }
 0x340   :  { %4544 = vst [vmem:[#allocation13_spill] sm:$0xff] %v4171_v18  ;;  %v1088_v20 = vadd.f32 %v1087_v4, %v4171_v18  ;;  %v1118_v34 = vmul.f32 %v4171_v18, %v4171_v18  ;;  %v4176_v24 = vpop.f32.mrb[15].mxu1 }
 0x341   :  { %v1101_v43 = vadd.f32 %v1100_v10, %v4176_v24  ;;  %v1119_v56 = vmul.f32 %v4176_v24, %v4176_v24 }
 0x342   :  { %v1130_v6 = vadd.f32 %v1129_v19, %v1118_v34 }
 0x343   :  { %v1143_v12 = vadd.f32 %v1142_v15, %v1119_v56  ;;  %v4181_v22 = vpop.f32.mrb[16].mxu1 }
 0x344   :  { %4545 = vst [vmem:[#allocation14_spill] sm:$0xff] %v4181_v22  ;;  %v1089_v27 = vadd.f32 %v1088_v20, %v4181_v22  ;;  %v1120_v31 = vmul.f32 %v4181_v22, %v4181_v22  ;;  %v4186_v32 = vpop.f32.mrb[17].mxu1 }
 0x345   :  { %4546 = vst [vmem:[#allocation15_spill] sm:$0xff] %v4186_v32  ;;  %v1102_v46 = vadd.f32 %v1101_v43, %v4186_v32  ;;  %v1121_v50 = vmul.f32 %v4186_v32, %v4186_v32 }
 0x346   :  { %v1131_v13 = vadd.f32 %v1130_v6, %v1120_v31 }
 0x347   :  { %v1144_v37 = vadd.f32 %v1143_v12, %v1121_v50  ;;  %v4191_v57 = vpop.f32.mrb[18].mxu1 }
 0x348   :  { %4547 = vst [vmem:[#allocation16_spill] sm:$0xff] %v4191_v57  ;;  %v1090_v58 = vadd.f32 %v1089_v27, %v4191_v57  ;;  %v1122_v9 = vmul.f32 %v4191_v57, %v4191_v57  ;;  %v4196_v0 = vpop.f32.mrb[19].mxu1 }
 0x349   :  { %4548 = vst [vmem:[#allocation17_spill] sm:$0xff] %v4196_v0  ;;  %v1103_v4 = vadd.f32 %v1102_v46, %v4196_v0  ;;  %v1123_v23 = vmul.f32 %v4196_v0, %v4196_v0 }
 0x34a   :  { %v1132_v10 = vadd.f32 %v1131_v13, %v1122_v9 }
 0x34b   :  { %v1145_v11 = vadd.f32 %v1144_v37, %v1123_v23  ;;  %v4201_v19 = vpop.f32.mrb[20].mxu1 }
 0x34c   :  { %4549 = vst [vmem:[#allocation18_spill] sm:$0xff] %v4201_v19  ;;  %v1091_v15 = vadd.f32 %v1090_v58, %v4201_v19  ;;  %v1124_v20 = vmul.f32 %v4201_v19, %v4201_v19  ;;  %v4206_v34 = vpop.f32.mrb[21].mxu1 }
 0x34d   :  { %4550 = vst [vmem:[#allocation19_spill] sm:$0xff] %v4206_v34  ;;  %v1104_v43 = vadd.f32 %v1103_v4, %v4206_v34  ;;  %v1125_v56 = vmul.f32 %v4206_v34, %v4206_v34 }
 0x34e   :  { %v1133_v6 = vadd.f32 %v1132_v10, %v1124_v20 }
 0x34f   :  { %v1146_v12 = vadd.f32 %v1145_v11, %v1125_v56  ;;  %v4211_v27 = vpop.f32.mrb[22].mxu1 }
 0x350   :  { %4551 = vst [vmem:[#allocation20_spill] sm:$0xff] %v4211_v27  ;;  %v1092_v31 = vadd.f32 %v1091_v15, %v4211_v27  ;;  %v1126_v46 = vmul.f32 %v4211_v27, %v4211_v27  ;;  %v4216_v50 = vpop.f32.mrb[23].mxu1 }
 0x351   :  { %4552 = vst [vmem:[#allocation21_spill] sm:$0xff] %v4216_v50  ;;  %v1105_v13 = vadd.f32 %v1104_v43, %v4216_v50  ;;  %v1127_v37 = vmul.f32 %v4216_v50, %v4216_v50 }
 0x352   :  { %v1093_v58 = vrot.slane %v1092_v31, 4  ;;  %v1134_v9 = vadd.f32 %v1133_v6, %v1126_v46  ;;  %v1820_v6 = vld [vmem:[#allocation7 + $0x150] sm:$0xff]  ;;  %v1839_v46 = vld [vmem:[#allocation7 + $0x1e8] sm:$0xff] }
 0x353   :  { %v1106_v4 = vrot.slane %v1105_v13, 4  ;;  %v1147_v23 = vadd.f32 %v1146_v12, %v1127_v37  ;;  %v1821_v12 = vld [vmem:[#allocation7 + $0x158] sm:$0xff]  ;;  %v1823_v37 = vld [vmem:[#allocation7 + $0x168] sm:$0xff] }
 0x354   :  { %v1094_v10 = vadd.f32 %v1093_v58, %v1092_v31  ;;  %v1838_v31 = vld [vmem:[#allocation7 + $0x1e0] sm:$0xff]  ;;  %v1840_v58 = vld [vmem:[#allocation7 + $0x1f0] sm:$0xff] }
 0x355   :  { %v1107_v11 = vadd.f32 %v1106_v4, %v1105_v13  ;;  %v1148_v20 = vrot.slane %v1147_v23, 4  ;;  %v1822_v13 = vld [vmem:[#allocation7 + $0x160] sm:$0xff]  ;;  %v1841_v4 = vld [vmem:[#allocation7 + $0x1f8] sm:$0xff] }
 0x356   :  { %v1095_v56 = vrot.slane %v1094_v10, 2 }
 0x357   :  { %v1108_v33 = vrot.slane %v1107_v11, 2  ;;  %v1149_v15 = vadd.f32 %v1148_v20, %v1147_v23  ;;  %v1824_v23 = vld [vmem:[#allocation7 + $0x170] sm:$0xff] }
 0x358   :  { %v1096_v19 = vadd.f32 %v1095_v56, %v1094_v10  ;;  %v1825_v10 = vld [vmem:[#allocation7 + $0x178] sm:$0xff] }
 0x359   :  { %v1109_v34 = vadd.f32 %v1108_v33, %v1107_v11  ;;  %v1150_v27 = vrot.slane %v1149_v15, 2  ;;  %v1135_v33 = vrot.slane %v1134_v9, 4  ;;  %v3407_v11 = vpack.c.bf16 %v1841_v4, %v1840_v58  ;;  %v4559_v4 = vld [vmem:[#allocation21_spill] sm:$0xff] }
 0x35a   :  { %v1097_v57 = vrot.slane %v1096_v19, 1  ;;  %v3409_v20 = vpack.c.bf16 %v1825_v10, %v1824_v23  ;;  %v4560_v23 = vld [vmem:[#allocation18_spill] sm:$0xff]  ;;  %v4561_v10 = vld [vmem:[#allocation20_spill] sm:$0xff] }
 0x35b   :  { %v1110_v22 = vrot.slane %v1109_v34, 1  ;;  %v1151_v0 = vadd.f32 %v1150_v27, %v1149_v15  ;;  %v3401_v27 = vpack.c.bf16 %v1821_v12, %v1820_v6  ;;  %v4553_v12 = vld [vmem:[#allocation13_spill] sm:$0xff] }
 0x35c   :  { %v1098_v18 = vadd.f32 %v1097_v57, %v1096_v19  ;;  %v1837_v19 = vld [vmem:[#allocation7 + $0x1d8] sm:$0xff] }
 0x35d   :  { %v1111_v43 = vadd.f32 %v1110_v22, %v1109_v34  ;;  %v1152_v32 = vrot.slane %v1151_v0, 1  ;;  %v1818_v22 = vld [vmem:[#allocation7 + $0x140] sm:$0xff] }
 0x35f   :  { %1282 = vmatprep.mubr.f32.mxu0 %v1111_v43  ;;  %v1153_v50 = vadd.f32 %v1152_v32, %v1151_v0  ;;  %v1819_v32 = vld [vmem:[#allocation7 + $0x148] sm:$0xff]  ;;  %v1836_v0 = vld [vmem:[#allocation7 + $0x1d0] sm:$0xff] }
 0x360   :  { %1283 = vmatmul.mubr.f32.vlgmr.msra.gmra.mrb[20].mxu0 %v1098_v18  ;;  %v3397_v57 = vpack.c.bf16 %v1819_v32, %v1818_v22  ;;  %v3399_v34 = vpack.c.bf16 %v1837_v19, %v1836_v0 }
 0x361   :  { %3286 = vmatpush1.bf16.msra.mxu0 %v3974_v41  ;;  %1353 = vmatprep.mubr.f32.mxu0 %v1153_v50  ;;  %v1136_v41 = vadd.f32 %v1135_v33, %v1134_v9  ;;  %v3403_v50 = vpack.c.bf16 %v1839_v46, %v1838_v31  ;;  %v3405_v9 = vpack.c.bf16 %v1823_v37, %v1822_v13  ;;  %v4554_v31 = vld [vmem:[#allocation15_spill] sm:$0xff] }
 0x362   :  { %3288 = vmatprep.subr.bf16.mxu0 %v3976_v42 }
 0x363   :  { %v1137_v42 = vrot.slane %v1136_v41, 2 }
 0x365   :  { %3290 = vmatpush1.bf16.msra.mxu0 %v3980_v47  ;;  %v1138_v47 = vadd.f32 %v1137_v42, %v1136_v41 }
 0x366   :  { %3292 = vmatprep.subr.bf16.mxu0 %v3983_v48 }
 0x367   :  { %v1139_v48 = vrot.slane %v1138_v47, 1 }
 0x369   :  { %3294 = vmatpush1.bf16.msra.mxu0 %v3986_v53  ;;  %v1140_v53 = vadd.f32 %v1139_v48, %v1138_v47 }
 0x36a   :  { %3296 = vmatprep.subr.bf16.mxu0 %v3989_v54  ;;  %v1826_v54 = vld [vmem:[#allocation7 + $0x180] sm:$0xff] }
 0x36d   :  { %3298 = vmatpush1.bf16.msra.mxu0 %v3992_v59  ;;  %v1827_v59 = vld [vmem:[#allocation7 + $0x188] sm:$0xff] }
 0x36e   :  { %3300 = vmatprep.subr.bf16.mxu0 %v3995_v60  ;;  %v3379_v60 = vpack.c.bf16 %v1827_v59, %v1826_v54 }
 0x371   :  { %3302 = vmatpush1.bf16.msra.mxu0 %v3998_v63  ;;  %v1810_v63 = vld [vmem:[#allocation7 + $0x100] sm:$0xff] }
 0x372   :  { %3304 = vmatprep.subr.bf16.mxu0 %v4074_v49  ;;  %v1811_v49 = vld [vmem:[#allocation7 + $0x108] sm:$0xff] }
 0x375   :  { %3306 = vmatpush1.bf16.msra.mxu0 %v4076_v3  ;;  %v3381_v3 = vpack.c.bf16 %v1811_v49, %v1810_v63 }
 0x376   :  { %3308 = vmatprep.subr.bf16.mxu0 %v4080_v16  ;;  %v1828_v16 = vld [vmem:[#allocation7 + $0x190] sm:$0xff] }
 0x379   :  { %3310 = vmatpush1.bf16.msra.mxu0 %v4082_v26  ;;  %v1829_v26 = vld [vmem:[#allocation7 + $0x198] sm:$0xff] }
 0x37a   :  { %3312 = vmatprep.subr.bf16.mxu0 %v4086_v30  ;;  %v3383_v30 = vpack.c.bf16 %v1829_v26, %v1828_v16  ;;  %v3716_v26 = vmov 1966171168  }
 0x37d   :  { %3314 = vmatpush1.bf16.msra.mxu0 %v4088_v35  ;;  %v1812_v35 = vld [vmem:[#allocation7 + $0x110] sm:$0xff] }
 0x37e   :  { %3316 = vmatprep.subr.bf16.mxu0 %v4092_v39  ;;  %v1813_v39 = vld [vmem:[#allocation7 + $0x118] sm:$0xff] }
 0x381   :  { %3318 = vmatpush1.bf16.msra.mxu0 %v4094_v45  ;;  %v3385_v45 = vpack.c.bf16 %v1813_v39, %v1812_v35  ;;  %v1381_v35 = vlaneseq }
 0x382   :  { %3320 = vmatprep.subr.bf16.mxu0 %v4098_v51  ;;  %v1830_v51 = vld [vmem:[#allocation7 + $0x1a0] sm:$0xff] }
 0x385   :  { %3322 = vmatpush1.bf16.msra.mxu0 %v4100_v55  ;;  %v1831_v55 = vld [vmem:[#allocation7 + $0x1a8] sm:$0xff] }
 0x386   :  { %3324 = vmatprep.subr.bf16.mxu0 %v4104_v62  ;;  %v3387_v62 = vpack.c.bf16 %v1831_v55, %v1830_v51 }
 0x389   :  { %3326 = vmatpush1.bf16.msra.mxu0 %v4106_v1  ;;  %v1814_v1 = vld [vmem:[#allocation7 + $0x120] sm:$0xff] }
 0x38a   :  { %3328 = vmatprep.subr.bf16.mxu0 %v4110_v5  ;;  %v1815_v5 = vld [vmem:[#allocation7 + $0x128] sm:$0xff] }
 0x38d   :  { %3330 = vmatpush1.bf16.msra.mxu0 %v4112_v8  ;;  %v3389_v8 = vpack.c.bf16 %v1815_v5, %v1814_v1 }
 0x38e   :  { %3332 = vmatprep.subr.bf16.mxu0 %v4116_v14  ;;  %v1832_v14 = vld [vmem:[#allocation7 + $0x1b0] sm:$0xff] }
 0x391   :  { %3334 = vmatpush1.bf16.msra.mxu0 %v4118_v17  ;;  %v1833_v17 = vld [vmem:[#allocation7 + $0x1b8] sm:$0xff] }
 0x392   :  { %3336 = vmatprep.subr.bf16.mxu0 %v4122_v21  ;;  %v3391_v21 = vpack.c.bf16 %v1833_v17, %v1832_v14 }
 0x395   :  { %3338 = vmatpush1.bf16.msra.mxu0 %v4124_v29  ;;  %v1816_v29 = vld [vmem:[#allocation7 + $0x130] sm:$0xff] }
 0x396   :  { %3340 = vmatprep.subr.bf16.mxu0 %v4128_v61  ;;  %v1817_v61 = vld [vmem:[#allocation7 + $0x138] sm:$0xff] }
 0x399   :  { %3342 = vmatpush1.bf16.msra.mxu0 %v4130_v25  ;;  %v3393_v25 = vpack.c.bf16 %v1817_v61, %v1816_v29 }
 0x39a   :  { %3344 = vmatprep.subr.bf16.mxu0 %v4134_v28  ;;  %v1834_v28 = vld [vmem:[#allocation7 + $0x1c0] sm:$0xff] }
 0x39d   :  { %3346 = vmatpush1.bf16.msra.mxu0 %v4136_v36  ;;  %v1835_v36 = vld [vmem:[#allocation7 + $0x1c8] sm:$0xff] }
 0x39e   :  { %3380 = vmatprep.subr.bf16.mxu0 %v3379_v60  ;;  %v3395_v18 = vpack.c.bf16 %v1835_v36, %v1834_v28 }
 0x3a0   :  { %1354 = vmatmul.mubr.f32.vlgmr.msra.gmra.mrb[22].mxu0 %v1140_v53 }
 0x3a1   :  { %3382 = vmatpush3.bf16.msra.mxu0 %v3381_v3 }
 0x3a2   :  { %3384 = vmatprep.subr.bf16.mxu0 %v3383_v30  ;;  %v1379_v30 = vunpack.c.l.s4 %v3716_v26 }
 0x3a4   :  { %v1380_v39 = vunpack.c.0.s8 %v1379_v30 }
 0x3a5   :  { %3386 = vmatpush3.bf16.msra.mxu0 %v3385_v45  ;;  %v1382_v45 = vshrl.u32 %v1381_v35, 7 }
 0x3a6   :  { %3388 = vmatprep.subr.bf16.mxu0 %v3387_v62 }
 0x3a7   :  { %v1383_v55 = vsub.s32 %v1380_v39, %v1382_v45  ;;  %v4255_v17 = vsub.s32 0, %v1382_v45 }
 0x3a9   :  { %3390 = vmatpush3.bf16.msra.mxu0 %v3389_v8  ;;  %v1370_v8 = vld [vmem:[%s4525_s5] sm:$0x3] }
 0x3aa   :  { %3392 = vmatprep.subr.bf16.mxu0 %v3391_v21  ;;  %v1402_v21 = vsub.s32 1, %v1382_v45 }
 0x3ad   :  { %3394 = vmatpush3.bf16.msra.mxu0 %v3393_v25 }
 0x3ae   :  { %3396 = vmatprep.subr.bf16.mxu0 %v3395_v18 }
 0x3b1   :  { %3398 = vmatpush3.bf16.msra.mxu0 %v3397_v57 }
 0x3b2   :  { %3400 = vmatprep.subr.bf16.mxu0 %v3399_v34 }
 0x3b5   :  { %3402 = vmatpush3.bf16.msra.mxu0 %v3401_v27 }
 0x3b6   :  { %3404 = vmatprep.subr.bf16.mxu0 %v3403_v50  ;;  %v4555_v50 = vld [vmem:[#allocation17_spill] sm:$0xff] }
 0x3b9   :  { %3406 = vmatpush3.bf16.msra.mxu0 %v3405_v9 }
 0x3ba   :  { %3408 = vmatprep.subr.bf16.mxu0 %v3407_v11 }
 0x3bd   :  { %3410 = vmatpush3.bf16.msra.mxu0 %v3409_v20 }
 0x433   :  { %v1284_v56 = vpop.f32.mrb[20].mxu0 }
 0x434   :  { %v1286_v15 = vpop.f32.mrb[21].mxu0  ;;  %v1360_v43 = vmul.f32 0.00048828125, %v1284_v56 }
 0x435   :  { %v1361_v33 = vmul.f32 0.00048828125, %v1286_v15 }
 0x436   :  { %v1364_v42 = vmul.f32 %v1360_v43, %v1360_v43 }
 0x437   :  { %v1365_v53 = vmul.f32 %v1361_v33, %v1361_v33 }
 0x473   :  { %v1355_v41 = vpop.f32.mrb[22].mxu0 }
 0x474   :  { %v1362_v47 = vmul.f32 0.00048828125, %v1355_v41  ;;  %v1357_v48 = vpop.f32.mrb[23].mxu0 }
 0x475   :  { %v1363_v54 = vmul.f32 0.00048828125, %v1357_v48 }
 0x476   :  { %v1366_v59 = vsub.f32 %v1362_v47, %v1364_v42 }
 0x477   :  { %v1367_v60 = vsub.f32 %v1363_v54, %v1365_v53 }
 0x478   :  { %v1368_v63 = vmax.f32 %v1366_v59, 0.0 }
 0x479   :  { %v1369_v49 = vmax.f32 %v1367_v60, 0.0 }
 0x47a   :  { %v1371_v3 = vadd.f32 1e-05, %v1368_v63 }
 0x47b   :  { %v1372_v16 = vadd.f32 1e-05, %v1369_v49 }
 0x47c   :  { %3584 = vrsqrt.f32 %v1371_v3 }
 0x47d   :  { %3586 = vrsqrt.f32 %v1372_v16 }
 0x486   :  { %v3585_v51 = vpop.eup %3584 }
 0x487   :  { %v3587_v62 = vpop.eup %3586 }
 0x488   :  { %v1377_v1 = vcombine.low %v3585_v51, %v3587_v62 }
 0x48a   :  { %v1384_v5 = vrot.slane %v1377_v1, %v1383_v55 }
 0x48c   :  { %v1391_v14 = vrot.slane %v1384_v5, %v1383_v55 }
 0x48e   :  { %v1393_v29 = vmul.f32 %v1391_v14, %v1370_v8 }
 0x490   :  { %v1399_v61 = vrot.slane %v1393_v29, %v4255_v17  ;;  %v1403_v25 = vrot.slane %v1393_v29, %v1402_v21 }
 0x492   :  { %v1406_v28 = vmul.f32 %v1399_v61, %v1360_v43  ;;  %v1407_v36 = vmul.f32 %v1403_v25, %v1361_v33  ;;  %v1428_v18 = vmul.f32 %v1403_v25, %v4143_v40  ;;  %v1430_v22 = vmul.f32 %v1403_v25, %v4153_v52  ;;  %v4556_v40 = vld [vmem:[#allocation14_spill] sm:$0xff]  ;;  %v4557_v52 = vld [vmem:[#allocation16_spill] sm:$0xff] }
 0x493   :  { %v1427_v32 = vmul.f32 %v1399_v61, %v4141_v38  ;;  %v1429_v57 = vmul.f32 %v1399_v61, %v4145_v44  ;;  %v1432_v0 = vmul.f32 %v1403_v25, %v4166_v7  ;;  %v1434_v19 = vmul.f32 %v1403_v25, %v4176_v24  ;;  %v4558_v38 = vld [vmem:[#allocation19_spill] sm:$0xff] }
 0x494   :  { %v1410_v34 = vcombine.low %v1406_v28, %v1407_v36  ;;  %v1431_v6 = vmul.f32 %v1399_v61, %v4161_v2  ;;  %v1433_v27 = vmul.f32 %v1399_v61, %v4553_v12  ;;  %v1436_v46 = vmul.f32 %v1403_v25, %v4554_v31  ;;  %v1394_v2 = vld [vmem:[%s4526_s6] sm:$0x3] }
 0x495   :  { %v1438_v13 = vmul.f32 %v1403_v25, %v4555_v50  ;;  %v1435_v37 = vmul.f32 %v1399_v61, %v4556_v40  ;;  %v1437_v58 = vmul.f32 %v1399_v61, %v4557_v52  ;;  %v1440_v9 = vmul.f32 %v1403_v25, %v4558_v38  ;;  %v1488_v50 = vld [vmem:[%s4527_s7 + $0x10] sm:$0xff]  ;;  %v1648_v40 = vld [vmem:[#allocation7 + $0x88] sm:$0xff] }
 0x496   :  { %v1417_v44 = vrot.slane %v1410_v34, %v1383_v55  ;;  %v1442_v7 = vmul.f32 %v1403_v25, %v4559_v4  ;;  %v1439_v24 = vmul.f32 %v1399_v61, %v4560_v23  ;;  %v1441_v11 = vmul.f32 %v1399_v61, %v4561_v10  ;;  %v1491_v38 = vld [vmem:[%s4527_s7 + $0x28] sm:$0xff]  ;;  %v1631_v4 = vld [vmem:[#allocation7] sm:$0xff]  ;;  %v1649_v23 = vld [vmem:[#allocation7 + $0x90] sm:$0xff] }
 0x497   :  { %v4562_v31 = vmov 0.0   ;;  %v2649_v10 = vld [vmem:[%s4527_s7 + $0x40] sm:$0xff] }
 0x498   :  { %v1424_v20 = vrot.slane %v1417_v44, %v1383_v55  ;;  %v1493_v44 = vld [vmem:[%s4527_s7 + $0x38] sm:$0xff] }
 0x49a   :  { %v1426_v56 = vsub.f32 %v1394_v2, %v1424_v20  ;;  %v1633_v20 = vld [vmem:[#allocation7 + $0x10] sm:$0xff] }
 0x49c   :  { %v1447_v15 = vrot.slane %v1426_v56, %v4255_v17  ;;  %v1451_v43 = vrot.slane %v1426_v56, %v1402_v21  ;;  %v1634_v56 = vld [vmem:[#allocation7 + $0x18] sm:$0xff] }
 0x49e   :  { %v1455_v33 = vadd.f32 %v1451_v43, %v1428_v18  ;;  %v1457_v41 = vadd.f32 %v1451_v43, %v1430_v22  ;;  %v1454_v42 = vadd.f32 %v1447_v15, %v1427_v32  ;;  %v1456_v47 = vadd.f32 %v1447_v15, %v1429_v57 }
 0x49f   :  { %v1459_v48 = vadd.f32 %v1451_v43, %v1432_v0  ;;  %v1461_v53 = vadd.f32 %v1451_v43, %v1434_v19  ;;  %v1458_v54 = vadd.f32 %v1447_v15, %v1431_v6  ;;  %v1460_v59 = vadd.f32 %v1447_v15, %v1433_v27  ;;  %v1486_v27 = vld [vmem:[%s4527_s7] sm:$0xff] }
 0x4a0   :  { %v1471_v60 = vmax.f32 %v1455_v33, 0.0  ;;  %v1473_v63 = vmax.f32 %v1457_v41, 0.0  ;;  %v1470_v49 = vmax.f32 %v1454_v42, 0.0  ;;  %v1472_v3 = vmax.f32 %v1456_v47, 0.0  ;;  %v2650_v33 = vld [vmem:[%s4527_s7 + $0x48] sm:$0xff]  ;;  %v1635_v47 = vld [vmem:[#allocation7 + $0x20] sm:$0xff] }
 0x4a1   :  { %v1475_v16 = vmax.f32 %v1459_v48, 0.0  ;;  %v1477_v26 = vmax.f32 %v1461_v53, 0.0  ;;  %v1474_v30 = vmax.f32 %v1458_v54, 0.0  ;;  %v1476_v35 = vmax.f32 %v1460_v59, 0.0  ;;  %v1636_v48 = vld [vmem:[#allocation7 + $0x28] sm:$0xff]  ;;  %v1653_v53 = vld [vmem:[#allocation7 + $0xb0] sm:$0xff] }
 0x4a2   :  { %v3347_v39 = vpack.c.bf16 %v1473_v63, %v1471_v60  ;;  %v4278_v45 = vpack.c.bf16 %v1472_v3, %v1470_v49  ;;  %v1463_v51 = vadd.f32 %v1451_v43, %v1436_v46  ;;  %v1465_v55 = vadd.f32 %v1451_v43, %v1438_v13  ;;  %v1487_v46 = vld [vmem:[%s4527_s7 + $0x8] sm:$0xff]  ;;  %v1647_v13 = vld [vmem:[#allocation7 + $0x80] sm:$0xff]  ;;  %v1654_v54 = vld [vmem:[#allocation7 + $0xb8] sm:$0xff] }
 0x4a3   :  { %v4280_v62 = vpack.c.bf16 %v1477_v26, %v1475_v16  ;;  %v4282_v1 = vpack.c.bf16 %v1476_v35, %v1474_v30  ;;  %v1462_v5 = vadd.f32 %v1447_v15, %v1435_v37  ;;  %v1464_v8 = vadd.f32 %v1447_v15, %v1437_v58  ;;  %v1489_v37 = vld [vmem:[%s4527_s7 + $0x18] sm:$0xff]  ;;  %v1490_v58 = vld [vmem:[%s4527_s7 + $0x20] sm:$0xff]  ;;  %v2651_v59 = vld [vmem:[%s4527_s7 + $0x50] sm:$0xff] }
 0x4a4   :  { %3348 = vmatprep.subr.bf16.mxu1 %v3347_v39  ;;  %3444 = vmatprep.subr.bf16.mxu0 %v3347_v39  ;;  %v1479_v14 = vmax.f32 %v1463_v51, 0.0  ;;  %v1481_v21 = vmax.f32 %v1465_v55, 0.0  ;;  %v1467_v29 = vadd.f32 %v1451_v43, %v1440_v9  ;;  %v1469_v61 = vadd.f32 %v1451_v43, %v1442_v7  ;;  %v1492_v9 = vld [vmem:[%s4527_s7 + $0x30] sm:$0xff]  ;;  %v1632_v7 = vld [vmem:[#allocation7 + $0x8] sm:$0xff]  ;;  %v1638_v3 = vld [vmem:[#allocation7 + $0x38] sm:$0xff] }
 0x4a5   :  { %3350 = vmatpush1.bf16.msra.mxu1 %v4278_v45  ;;  %v1478_v25 = vmax.f32 %v1462_v5, 0.0  ;;  %v1480_v28 = vmax.f32 %v1464_v8, 0.0  ;;  %v1466_v36 = vadd.f32 %v1447_v15, %v1439_v24  ;;  %v1468_v18 = vadd.f32 %v1447_v15, %v1441_v11  ;;  %v1650_v24 = vld [vmem:[#allocation7 + $0x98] sm:$0xff]  ;;  %v1651_v15 = vld [vmem:[#allocation7 + $0xa0] sm:$0xff]  ;;  %v1652_v43 = vld [vmem:[#allocation7 + $0xa8] sm:$0xff] }
 0x4a6   :  { %3352 = vmatprep.subr.bf16.mxu1 %v4280_v62  ;;  %v4286_v22 = vpack.c.bf16 %v1481_v21, %v1479_v14  ;;  %v1483_v32 = vmax.f32 %v1467_v29, 0.0  ;;  %v1485_v57 = vmax.f32 %v1469_v61, 0.0  ;;  %v3411_v52 = vpack.c.bf16 %v1648_v40, %v1647_v13  ;;  %v1637_v49 = vld [vmem:[#allocation7 + $0x30] sm:$0xff]  ;;  %v1655_v16 = vld [vmem:[#allocation7 + $0xc0] sm:$0xff]  ;;  %v1656_v26 = vld [vmem:[#allocation7 + $0xc8] sm:$0xff] }
 0x4a7   :  { %v4288_v0 = vpack.c.bf16 %v1480_v28, %v1478_v25  ;;  %v1482_v19 = vmax.f32 %v1466_v36, 0.0  ;;  %v1484_v34 = vmax.f32 %v1468_v18, 0.0  ;;  %v3413_v11 = vpack.c.bf16 %v1632_v7, %v1631_v4  ;;  %v2652_v30 = vld [vmem:[%s4527_s7 + $0x58] sm:$0xff]  ;;  %v1639_v51 = vld [vmem:[#allocation7 + $0x40] sm:$0xff]  ;;  %v1640_v55 = vld [vmem:[#allocation7 + $0x48] sm:$0xff] }
 0x4a8   :  { %v4290_v6 = vpack.c.bf16 %v1485_v57, %v1483_v32  ;;  %v3415_v2 = vpack.c.bf16 %v1650_v24, %v1649_v23  ;;  %v3417_v41 = vpack.c.bf16 %v1634_v56, %v1633_v20  ;;  %v3419_v42 = vpack.c.bf16 %v1652_v43, %v1651_v15  ;;  %v1657_v5 = vld [vmem:[#allocation7 + $0xd0] sm:$0xff]  ;;  %v1658_v8 = vld [vmem:[#allocation7 + $0xd8] sm:$0xff]  ;;  %v2653_v14 = vld [vmem:[%s4527_s7 + $0x60] sm:$0xff] }
 0x4a9   :  { %3354 = vmatpush1.bf16.msra.mxu1 %v4282_v1  ;;  %v4293_v12 = vpack.c.bf16 %v1484_v34, %v1482_v19  ;;  %v3421_v60 = vpack.c.bf16 %v1636_v48, %v1635_v47  ;;  %v3423_v63 = vpack.c.bf16 %v1654_v54, %v1653_v53  ;;  %v3425_v35 = vpack.c.bf16 %v1638_v3, %v1637_v49  ;;  %v1641_v61 = vld [vmem:[#allocation7 + $0x50] sm:$0xff]  ;;  %v1642_v25 = vld [vmem:[#allocation7 + $0x58] sm:$0xff]  ;;  %v1659_v28 = vld [vmem:[#allocation7 + $0xe0] sm:$0xff] }
 0x4aa   :  { %3356 = vmatprep.subr.bf16.mxu1 %v4286_v22  ;;  %v3429_v21 = vpack.c.bf16 %v1640_v55, %v1639_v51  ;;  %v3431_v29 = vpack.c.bf16 %v1658_v8, %v1657_v5  ;;  %v1660_v36 = vld [vmem:[#allocation7 + $0xe8] sm:$0xff]  ;;  %v3433_v32 = vpack.c.bf16 %v1642_v25, %v1641_v61  ;;  %v1643_v19 = vld [vmem:[#allocation7 + $0x60] sm:$0xff]  ;;  %v2671_v55 = vld [vmem:[%s4527_s7 + $0xb0] sm:$0xff] }
 0x4ab   :  { %v2654_v18 = vld [vmem:[%s4527_s7 + $0x68] sm:$0xff]  ;;  %v3435_v57 = vpack.c.bf16 %v1660_v36, %v1659_v28  ;;  %v2672_v5 = vld [vmem:[%s4527_s7 + $0xb8] sm:$0xff]  ;;  %v2215_v8 = vld [vmem:[#allocation7 + $0x280] sm:$0xff] }
 0x4ac   :  { %v1644_v34 = vld [vmem:[#allocation7 + $0x68] sm:$0xff]  ;;  %v2217_v28 = vld [vmem:[#allocation7 + $0x290] sm:$0xff]  ;;  %v2218_v36 = vld [vmem:[#allocation7 + $0x298] sm:$0xff] }
 0x4ad   :  { %3358 = vmatpush1.bf16.msra.mxu1 %v4288_v0  ;;  %v3437_v13 = vpack.c.bf16 %v1644_v34, %v1643_v19  ;;  %v2670_v51 = vld [vmem:[%s4527_s7 + $0xa8] sm:$0xff]  ;;  %v2219_v34 = vld [vmem:[#allocation7 + $0x2a0] sm:$0xff] }
 0x4ae   :  { %3360 = vmatprep.subr.bf16.mxu1 %v4290_v6  ;;  %v2200_v61 = vld [vmem:[#allocation7 + $0x208] sm:$0xff] }
 0x4b1   :  { %3362 = vmatpush1.bf16.msra.mxu1 %v4293_v12 }
 0x4b2   :  { %3364 = vmatprep.subr.bf16.mxu1 %v3347_v39  ;;  %v3427_v39 = vpack.c.bf16 %v1656_v26, %v1655_v16 }
 0x4b4   :  { %2641 = vmatmul.mubr.msk.f32.vlgmr.msra.gmra.mrb[24].mxu1 %vm121_vm0, %v1486_v27  ;;  %v1661_v27 = vld [vmem:[#allocation7 + $0xf0] sm:$0xff] }
 0x4b5   :  { %3366 = vmatpush1.bf16.msra.mxu1 %v4278_v45  ;;  %1588 = vmatprep.mubr.f32.mxu1 %v4562_v31 }
 0x4b6   :  { %3368 = vmatprep.subr.bf16.mxu1 %v4280_v62 }
 0x4b8   :  { %2642 = vmatmul.mubr.msk.f32.gmra.mrb[26].mxu1 %vm121_vm0, %v1487_v46  ;;  %v1662_v46 = vld [vmem:[#allocation7 + $0xf8] sm:$0xff] }
 0x4b9   :  { %3370 = vmatpush1.bf16.msra.mxu1 %v4282_v1  ;;  %1594 = vmatprep.mubr.f32.mxu1 %v4562_v31  ;;  %v3439_v40 = vpack.c.bf16 %v1662_v46, %v1661_v27  ;;  %v2220_v27 = vld [vmem:[#allocation7 + $0x2a8] sm:$0xff]  ;;  %v2203_v46 = vld [vmem:[#allocation7 + $0x220] sm:$0xff] }
 0x4ba   :  { %3372 = vmatprep.subr.bf16.mxu1 %v4286_v22 }
 0x4bc   :  { %2643 = vmatmul.mubr.msk.f32.gmra.mrb[28].mxu1 %vm121_vm0, %v1488_v50  ;;  %v2655_v50 = vld [vmem:[%s4527_s7 + $0x70] sm:$0xff] }
 0x4bd   :  { %3374 = vmatpush1.bf16.msra.mxu1 %v4288_v0  ;;  %1600 = vmatprep.mubr.f32.mxu1 %v4562_v31 }
 0x4be   :  { %3376 = vmatprep.subr.bf16.mxu1 %v4290_v6 }
 0x4c0   :  { %2644 = vmatmul.mubr.msk.f32.gmra.mrb[30].mxu1 %vm121_vm0, %v1489_v37  ;;  %v2656_v37 = vld [vmem:[%s4527_s7 + $0x78] sm:$0xff] }
 0x4c1   :  { %3378 = vmatpush1.bf16.msra.mxu1 %v4293_v12  ;;  %1606 = vmatprep.mubr.f32.mxu1 %v4562_v31 }
 0x4c2   :  { %3412 = vmatprep.subr.bf16.mxu1 %v3411_v52  ;;  %v1645_v52 = vld [vmem:[#allocation7 + $0x70] sm:$0xff] }
 0x4c4   :  { %2645 = vmatmul.mubr.msk.f32.gmra.mrb[32].mxu1 %vm121_vm0, %v1490_v58  ;;  %v1646_v58 = vld [vmem:[#allocation7 + $0x78] sm:$0xff] }
 0x4c5   :  { %1612 = vmatprep.mubr.f32.mxu1 %v4562_v31 }
 0x4c8   :  { %2646 = vmatmul.mubr.msk.f32.gmra.mrb[34].mxu1 %vm121_vm0, %v1491_v38  ;;  %v3441_v38 = vpack.c.bf16 %v1646_v58, %v1645_v52  ;;  %v2222_v52 = vld [vmem:[#allocation7 + $0x2b8] sm:$0xff]  ;;  %v2205_v58 = vld [vmem:[#allocation7 + $0x230] sm:$0xff] }
 0x4c9   :  { %1618 = vmatprep.mubr.f32.mxu1 %v4562_v31 }
 0x4cc   :  { %2647 = vmatmul.mubr.msk.f32.gmra.mrb[36].mxu1 %vm121_vm0, %v1492_v9 }
 0x4cd   :  { %1624 = vmatprep.mubr.f32.mxu1 %v4562_v31 }
 0x4d0   :  { %2648 = vmatmul.mubr.msk.f32.gmra.mrb[38].mxu1 %vm121_vm0, %v1493_v44 }
 0x4d1   :  { %1760 = vmatprep.mubr.f32.mxu1 %v4562_v31 }
 0x4d4   :  { %2657 = vmatmul.mubr.msk.f32.vlgmr.msra.gmra.mrb[40].mxu1 %vm121_vm0, %v2649_v10 }
 0x4d5   :  { %1766 = vmatprep.mubr.f32.mxu1 %v4562_v31  ;;  %3414 = vmatpush3.bf16.msra.mxu1 %v3413_v11 }
 0x4d6   :  { %3416 = vmatprep.subr.bf16.mxu1 %v3415_v2 }
 0x4d8   :  { %2658 = vmatmul.mubr.msk.f32.gmra.mrb[42].mxu1 %vm121_vm0, %v2650_v33 }
 0x4d9   :  { %1772 = vmatprep.mubr.f32.mxu1 %v4562_v31  ;;  %3418 = vmatpush3.bf16.msra.mxu1 %v3417_v41 }
 0x4da   :  { %3420 = vmatprep.subr.bf16.mxu1 %v3419_v42 }
 0x4dc   :  { %2659 = vmatmul.mubr.msk.f32.gmra.mrb[44].mxu1 %vm121_vm0, %v2651_v59 }
 0x4dd   :  { %1778 = vmatprep.mubr.f32.mxu1 %v4562_v31  ;;  %3422 = vmatpush3.bf16.msra.mxu1 %v3421_v60 }
 0x4de   :  { %3424 = vmatprep.subr.bf16.mxu1 %v3423_v63 }
 0x4e0   :  { %2660 = vmatmul.mubr.msk.f32.gmra.mrb[46].mxu1 %vm121_vm0, %v2652_v30  ;;  %v2667_v30 = vld [vmem:[%s4527_s7 + $0x90] sm:$0xff] }
 0x4e1   :  { %1784 = vmatprep.mubr.f32.mxu1 %v4562_v31  ;;  %3426 = vmatpush3.bf16.msra.mxu1 %v3425_v35  ;;  %v2668_v35 = vld [vmem:[%s4527_s7 + $0x98] sm:$0xff] }
 0x4e2   :  { %3428 = vmatprep.subr.bf16.mxu1 %v3427_v39  ;;  %v2669_v39 = vld [vmem:[%s4527_s7 + $0xa0] sm:$0xff] }
 0x4e4   :  { %2661 = vmatmul.mubr.msk.f32.gmra.mrb[48].mxu1 %vm121_vm0, %v2653_v14  ;;  %v2216_v14 = vld [vmem:[#allocation7 + $0x288] sm:$0xff] }
 0x4e5   :  { %1790 = vmatprep.mubr.f32.mxu1 %v4562_v31  ;;  %3430 = vmatpush3.bf16.msra.mxu1 %v3429_v21  ;;  %v2199_v21 = vld [vmem:[#allocation7 + $0x200] sm:$0xff] }
 0x4e6   :  { %3432 = vmatprep.subr.bf16.mxu1 %v3431_v29  ;;  %v3459_v29 = vpack.c.bf16 %v2216_v14, %v2215_v8  ;;  %v3461_v25 = vpack.c.bf16 %v2200_v61, %v2199_v21 }
 0x4e8   :  { %2662 = vmatmul.mubr.msk.f32.gmra.mrb[50].mxu1 %vm121_vm0, %v2654_v18  ;;  %v2201_v18 = vld [vmem:[#allocation7 + $0x210] sm:$0xff] }
 0x4e9   :  { %1796 = vmatprep.mubr.f32.mxu1 %v4562_v31  ;;  %3434 = vmatpush3.bf16.msra.mxu1 %v3433_v32  ;;  %v3463_v32 = vpack.c.bf16 %v2218_v36, %v2217_v28 }
 0x4ea   :  { %3436 = vmatprep.subr.bf16.mxu1 %v3435_v57  ;;  %v2202_v57 = vld [vmem:[#allocation7 + $0x218] sm:$0xff] }
 0x4eb   :  { %v3465_v19 = vpack.c.bf16 %v2202_v57, %v2201_v18 }
 0x4ec   :  { %2663 = vmatmul.mubr.msk.f32.gmra.mrb[52].mxu1 %vm121_vm0, %v2655_v50  ;;  %v3467_v50 = vpack.c.bf16 %v2220_v27, %v2219_v34 }
 0x4ed   :  { %1802 = vmatprep.mubr.f32.mxu1 %v4562_v31  ;;  %3438 = vmatpush3.bf16.msra.mxu1 %v3437_v13  ;;  %v2204_v13 = vld [vmem:[#allocation7 + $0x228] sm:$0xff] }
 0x4ee   :  { %3440 = vmatprep.subr.bf16.mxu1 %v3439_v40  ;;  %v3469_v40 = vpack.c.bf16 %v2204_v13, %v2203_v46 }
 0x4f0   :  { %2664 = vmatmul.mubr.msk.f32.gmra.mrb[54].mxu1 %vm121_vm0, %v2656_v37  ;;  %v2221_v37 = vld [vmem:[#allocation7 + $0x2b0] sm:$0xff] }
 0x4f1   :  { %3442 = vmatpush3.bf16.msra.mxu1 %v3441_v38  ;;  %v3471_v38 = vpack.c.bf16 %v2222_v52, %v2221_v37 }
 0x4f2   :  { %3460 = vmatprep.subr.bf16.mxu1 %v3459_v29 }
 0x587   :  { %v1584_v9 = vpop.f32.mrb[24].mxu1 }
 0x588   :  { %v1586_v44 = vpop.f32.mrb[25].mxu1 }
 0x589   :  { %2011 = vmatprep.mubr.f32.mxu1 %v1586_v44 }
 0x58a   :  { %2012 = vmatmul.mubr.f32.vlgmr.msra.gmra.mrb[56].mxu1 %v1584_v9  ;;  %v2206_v9 = vld [vmem:[#allocation7 + $0x238] sm:$0xff] }
 0x58b   :  { %v1590_v4 = vpop.f32.mrb[26].mxu1  ;;  %3462 = vmatpush3.bf16.msra.mxu1 %v3461_v25  ;;  %v3473_v44 = vpack.c.bf16 %v2206_v9, %v2205_v58 }
 0x58c   :  { %v1592_v7 = vpop.f32.mrb[27].mxu1  ;;  %3464 = vmatprep.subr.bf16.mxu1 %v3463_v32 }
 0x58d   :  { %2016 = vmatprep.mubr.f32.mxu1 %v1592_v7  ;;  %v2224_v7 = vld [vmem:[#allocation7 + $0x2c8] sm:$0xff] }
 0x58e   :  { %2017 = vmatmul.mubr.f32.gmra.mrb[58].mxu1 %v1590_v4  ;;  %v2223_v4 = vld [vmem:[#allocation7 + $0x2c0] sm:$0xff] }
 0x58f   :  { %v1596_v23 = vpop.f32.mrb[28].mxu1  ;;  %3466 = vmatpush3.bf16.msra.mxu1 %v3465_v19 }
 0x590   :  { %v1598_v24 = vpop.f32.mrb[29].mxu1  ;;  %3468 = vmatprep.subr.bf16.mxu1 %v3467_v50 }
 0x591   :  { %2021 = vmatprep.mubr.f32.mxu1 %v1598_v24  ;;  %v3475_v24 = vpack.c.bf16 %v2224_v7, %v2223_v4 }
 0x592   :  { %2022 = vmatmul.mubr.f32.gmra.mrb[60].mxu1 %v1596_v23  ;;  %v2207_v23 = vld [vmem:[#allocation7 + $0x240] sm:$0xff] }
 0x593   :  { %v1602_v10 = vpop.f32.mrb[30].mxu1  ;;  %3470 = vmatpush3.bf16.msra.mxu1 %v3469_v40 }
 0x594   :  { %v1604_v11 = vpop.f32.mrb[31].mxu1  ;;  %3472 = vmatprep.subr.bf16.mxu1 %v3471_v38 }
 0x595   :  { %2026 = vmatprep.mubr.f32.mxu1 %v1604_v11 }
 0x596   :  { %2027 = vmatmul.mubr.f32.gmra.mrb[62].mxu1 %v1602_v10  ;;  %v2208_v10 = vld [vmem:[#allocation7 + $0x248] sm:$0xff] }
 0x597   :  { %v1608_v2 = vpop.f32.mrb[32].mxu1  ;;  %3474 = vmatpush3.bf16.msra.mxu1 %v3473_v44  ;;  %v3477_v11 = vpack.c.bf16 %v2208_v10, %v2207_v23 }
 0x598   :  { %v1610_v20 = vpop.f32.mrb[33].mxu1  ;;  %3476 = vmatprep.subr.bf16.mxu1 %v3475_v24 }
 0x599   :  { %2031 = vmatprep.mubr.f32.mxu1 %v1610_v20  ;;  %v2226_v20 = vld [vmem:[#allocation7 + $0x2d8] sm:$0xff] }
 0x59a   :  { %2032 = vmatmul.mubr.f32.gmra.mrb[64].mxu1 %v1608_v2  ;;  %v2225_v2 = vld [vmem:[#allocation7 + $0x2d0] sm:$0xff] }
 0x59b   :  { %v1614_v56 = vpop.f32.mrb[34].mxu1  ;;  %3478 = vmatpush3.bf16.msra.mxu1 %v3477_v11 }
 0x59c   :  { %v1616_v15 = vpop.f32.mrb[35].mxu1 }
 0x59d   :  { %2036 = vmatprep.mubr.f32.mxu1 %v1616_v15  ;;  %v3479_v15 = vpack.c.bf16 %v2226_v20, %v2225_v2 }
 0x59e   :  { %2037 = vmatmul.mubr.f32.gmra.mrb[66].mxu1 %v1614_v56  ;;  %v2209_v56 = vld [vmem:[#allocation7 + $0x250] sm:$0xff] }
 0x59f   :  { %v1620_v43 = vpop.f32.mrb[36].mxu1  ;;  %3480 = vmatprep.subr.bf16.mxu1 %v3479_v15 }
 0x5a0   :  { %v1622_v33 = vpop.f32.mrb[37].mxu1 }
 0x5a1   :  { %2041 = vmatprep.mubr.f32.mxu1 %v1622_v33 }
 0x5a2   :  { %2042 = vmatmul.mubr.f32.gmra.mrb[68].mxu1 %v1620_v43  ;;  %v2210_v43 = vld [vmem:[#allocation7 + $0x258] sm:$0xff] }
 0x5a3   :  { %v1626_v41 = vpop.f32.mrb[38].mxu1  ;;  %v3481_v33 = vpack.c.bf16 %v2210_v43, %v2209_v56 }
 0x5a4   :  { %v1628_v42 = vpop.f32.mrb[39].mxu1 }
 0x5a5   :  { %2046 = vmatprep.mubr.f32.mxu1 %v1628_v42  ;;  %3482 = vmatpush3.bf16.msra.mxu1 %v3481_v33  ;;  %v2228_v42 = vld [vmem:[#allocation7 + $0x2e8] sm:$0xff] }
 0x5a6   :  { %2047 = vmatmul.mubr.f32.gmra.mrb[70].mxu1 %v1626_v41  ;;  %v2227_v41 = vld [vmem:[#allocation7 + $0x2e0] sm:$0xff] }
 0x5a7   :  { %v1762_v47 = vpop.f32.mrb[40].mxu1 }
 0x5a8   :  { %v1764_v48 = vpop.f32.mrb[41].mxu1 }
 0x5a9   :  { %1906 = vmatprep.mubr.f32.mxu0 %v1764_v48  ;;  %v3483_v48 = vpack.c.bf16 %v2228_v42, %v2227_v41 }
 0x5aa   :  { %1907 = vmatmul.mubr.f32.vlgmr.msra.gmra.mrb[24].mxu0 %v1762_v47  ;;  %v2211_v47 = vld [vmem:[#allocation7 + $0x260] sm:$0xff] }
 0x5ab   :  { %3446 = vmatpush1.bf16.msra.mxu0 %v4278_v45  ;;  %v1768_v53 = vpop.f32.mrb[42].mxu1  ;;  %3484 = vmatprep.subr.bf16.mxu1 %v3483_v48 }
 0x5ac   :  { %3448 = vmatprep.subr.bf16.mxu0 %v4280_v62  ;;  %v1770_v54 = vpop.f32.mrb[43].mxu1 }
 0x5ad   :  { %1911 = vmatprep.mubr.f32.mxu0 %v1770_v54 }
 0x5ae   :  { %1912 = vmatmul.mubr.f32.gmra.mrb[26].mxu0 %v1768_v53  ;;  %v2212_v53 = vld [vmem:[#allocation7 + $0x268] sm:$0xff] }
 0x5af   :  { %3450 = vmatpush1.bf16.msra.mxu0 %v4282_v1  ;;  %v1774_v59 = vpop.f32.mrb[44].mxu1  ;;  %v3485_v54 = vpack.c.bf16 %v2212_v53, %v2211_v47 }
 0x5b0   :  { %3452 = vmatprep.subr.bf16.mxu0 %v4286_v22  ;;  %v1776_v60 = vpop.f32.mrb[45].mxu1 }
 0x5b1   :  { %1916 = vmatprep.mubr.f32.mxu0 %v1776_v60  ;;  %3486 = vmatpush3.bf16.msra.mxu1 %v3485_v54  ;;  %v2230_v60 = vld [vmem:[#allocation7 + $0x2f8] sm:$0xff] }
 0x5b2   :  { %1917 = vmatmul.mubr.f32.gmra.mrb[28].mxu0 %v1774_v59  ;;  %v2229_v59 = vld [vmem:[#allocation7 + $0x2f0] sm:$0xff] }
 0x5b3   :  { %3454 = vmatpush1.bf16.msra.mxu0 %v4288_v0  ;;  %v1780_v63 = vpop.f32.mrb[46].mxu1 }
 0x5b4   :  { %3456 = vmatprep.subr.bf16.mxu0 %v4290_v6  ;;  %v1782_v45 = vpop.f32.mrb[47].mxu1  ;;  %v2665_v6 = vld [vmem:[%s4527_s7 + $0x80] sm:$0xff] }
 0x5b5   :  { %1921 = vmatprep.mubr.f32.mxu0 %v1782_v45  ;;  %v3487_v45 = vpack.c.bf16 %v2230_v60, %v2229_v59 }
 0x5b6   :  { %1922 = vmatmul.mubr.f32.gmra.mrb[30].mxu0 %v1780_v63  ;;  %v2213_v63 = vld [vmem:[#allocation7 + $0x270] sm:$0xff] }
 0x5b7   :  { %3458 = vmatpush1.bf16.msra.mxu0 %v4293_v12  ;;  %v1786_v62 = vpop.f32.mrb[48].mxu1  ;;  %v2666_v12 = vld [vmem:[%s4527_s7 + $0x88] sm:$0xff]  ;;  %3488 = vmatprep.subr.bf16.mxu1 %v3487_v45 }
 0x5b8   :  { %v1788_v49 = vpop.f32.mrb[49].mxu1 }
 0x5b9   :  { %1926 = vmatprep.mubr.f32.mxu0 %v1788_v49 }
 0x5ba   :  { %1927 = vmatmul.mubr.f32.gmra.mrb[32].mxu0 %v1786_v62  ;;  %v2214_v62 = vld [vmem:[#allocation7 + $0x278] sm:$0xff] }
 0x5bb   :  { %v1792_v1 = vpop.f32.mrb[50].mxu1  ;;  %v3489_v49 = vpack.c.bf16 %v2214_v62, %v2213_v63 }
 0x5bc   :  { %v1794_v3 = vpop.f32.mrb[51].mxu1 }
 0x5bd   :  { %1931 = vmatprep.mubr.f32.mxu0 %v1794_v3  ;;  %3490 = vmatpush3.bf16.msra.mxu1 %v3489_v49 }
 0x5be   :  { %1932 = vmatmul.mubr.f32.gmra.mrb[34].mxu0 %v1792_v1 }
 0x5bf   :  { %v1798_v22 = vpop.f32.mrb[52].mxu1 }
 0x5c0   :  { %v1800_v16 = vpop.f32.mrb[53].mxu1 }
 0x5c1   :  { %1936 = vmatprep.mubr.f32.mxu0 %v1800_v16 }
 0x5c2   :  { %1937 = vmatmul.mubr.f32.gmra.mrb[36].mxu0 %v1798_v22 }
 0x5c3   :  { %v1804_v0 = vpop.f32.mrb[54].mxu1 }
 0x5c4   :  { %v1806_v26 = vpop.f32.mrb[55].mxu1 }
 0x5c5   :  { %1941 = vmatprep.mubr.f32.mxu0 %v1806_v26 }
 0x5c6   :  { %1942 = vmatmul.mubr.f32.gmra.mrb[38].mxu0 %v1804_v0 }
 0x5c7   :  { %2149 = vmatprep.mubr.f32.mxu0 %v4562_v31 }
 0x5ca   :  { %2673 = vmatmul.mubr.msk.f32.vlgmr.msra.gmra.mrb[40].mxu0 %vm121_vm0, %v2665_v6 }
 0x5cb   :  { %2155 = vmatprep.mubr.f32.mxu0 %v4562_v31 }
 0x5ce   :  { %2674 = vmatmul.mubr.msk.f32.gmra.mrb[42].mxu0 %vm121_vm0, %v2666_v12 }
 0x5cf   :  { %2161 = vmatprep.mubr.f32.mxu0 %v4562_v31 }
 0x5d2   :  { %2675 = vmatmul.mubr.msk.f32.gmra.mrb[44].mxu0 %vm121_vm0, %v2667_v30 }
 0x5d3   :  { %2167 = vmatprep.mubr.f32.mxu0 %v4562_v31 }
 0x5d6   :  { %2676 = vmatmul.mubr.msk.f32.gmra.mrb[46].mxu0 %vm121_vm0, %v2668_v35 }
 0x5d7   :  { %2173 = vmatprep.mubr.f32.mxu0 %v4562_v31 }
 0x5da   :  { %2677 = vmatmul.mubr.msk.f32.gmra.mrb[48].mxu0 %vm121_vm0, %v2669_v39 }
 0x5db   :  { %2179 = vmatprep.mubr.f32.mxu0 %v4562_v31 }
 0x5de   :  { %2678 = vmatmul.mubr.msk.f32.gmra.mrb[50].mxu0 %vm121_vm0, %v2670_v51 }
 0x5df   :  { %2185 = vmatprep.mubr.f32.mxu0 %v4562_v31 }
 0x5e2   :  { %2679 = vmatmul.mubr.msk.f32.gmra.mrb[52].mxu0 %vm121_vm0, %v2671_v55 }
 0x5e3   :  { %2191 = vmatprep.mubr.f32.mxu0 %v4562_v31 }
 0x5e6   :  { %2680 = vmatmul.mubr.msk.f32.gmra.mrb[54].mxu0 %vm121_vm0, %v2672_v5 }
 0x5e7   :  { %3045 = vmatprep.mubr.msk.f32.mxu0 %vm3718_vm2, %v4562_v31 }
 0x65d   :  { %v2817_v1 = vpop.f32.mrb[56].mxu1 }
 0x65e   :  { %v2818_v3 = vpop.f32.mrb[57].mxu1 }
 0x65f   :  { %v2819_v22 = vadd.f32 %v2818_v3, %v2817_v1 }
 0x661   :  { %v2820_v16 = vpop.f32.mrb[58].mxu1 }
 0x662   :  { %v2821_v0 = vpop.f32.mrb[59].mxu1 }
 0x663   :  { %v2822_v26 = vadd.f32 %v2821_v0, %v2820_v16 }
 0x665   :  { %v2823_v6 = vpop.f32.mrb[60].mxu1 }
 0x666   :  { %v2824_v12 = vpop.f32.mrb[61].mxu1 }
 0x667   :  { %v2825_v30 = vadd.f32 %v2824_v12, %v2823_v6 }
 0x669   :  { %v2826_v35 = vpop.f32.mrb[62].mxu1 }
 0x66a   :  { %v2827_v39 = vpop.f32.mrb[63].mxu1 }
 0x66b   :  { %v2828_v51 = vadd.f32 %v2827_v39, %v2826_v35  ;;  %v3717_v39 = vmov 0.0|0.0  }
 0x66c   :  { %3491 = vmatprep.subr.bf16.mxu0 %v3717_v39  ;;  %3515 = vmatprep.subr.bf16.mxu1 %v3717_v39 }
 0x66d   :  { %v2829_v55 = vpop.f32.mrb[64].mxu1 }
 0x66e   :  { %v2830_v5 = vpop.f32.mrb[65].mxu1 }
 0x66f   :  { %v2831_v8 = vadd.f32 %v2830_v5, %v2829_v55  ;;  %v2379_v55 = vld [vmem:[#allocation9 + $0x8] sm:$0xff] }
 0x671   :  { %v2832_v14 = vpop.f32.mrb[66].mxu1 }
 0x672   :  { %v2833_v21 = vpop.f32.mrb[67].mxu1 }
 0x673   :  { %v2834_v29 = vadd.f32 %v2833_v21, %v2832_v14  ;;  %v2381_v14 = vld [vmem:[#allocation9 + $0x18] sm:$0xff] }
 0x675   :  { %v2835_v61 = vpop.f32.mrb[68].mxu1 }
 0x676   :  { %v2836_v25 = vpop.f32.mrb[69].mxu1 }
 0x677   :  { %v2837_v28 = vadd.f32 %v2836_v25, %v2835_v61  ;;  %v2383_v61 = vld [vmem:[#allocation9 + $0x28] sm:$0xff] }
 0x679   :  { %v2838_v36 = vpop.f32.mrb[70].mxu1 }
 0x67a   :  { %v2839_v18 = vpop.f32.mrb[71].mxu1 }
 0x67b   :  { %v2840_v32 = vadd.f32 %v2839_v18, %v2838_v36  ;;  %v2385_v36 = vld [vmem:[#allocation9 + $0x38] sm:$0xff] }
 0x67d   :  { %v2761_v57 = vpop.f32.mrb[24].mxu0 }
 0x67e   :  { %v2762_v19 = vpop.f32.mrb[25].mxu0 }
 0x67f   :  { %v2763_v34 = vadd.f32 %v2762_v19, %v2761_v57  ;;  %v2387_v57 = vld [vmem:[#allocation9 + $0x48] sm:$0xff] }
 0x681   :  { %v4432_v27 = vadd.f32 %v2819_v22, %v2763_v34  ;;  %v2764_v46 = vpop.f32.mrb[26].mxu0  ;;  %v2388_v34 = vld [vmem:[#allocation9 + $0x50] sm:$0xff] }
 0x682   :  { %v2765_v50 = vpop.f32.mrb[27].mxu0 }
 0x683   :  { %v2766_v13 = vadd.f32 %v2765_v50, %v2764_v46  ;;  %v2389_v46 = vld [vmem:[#allocation9 + $0x58] sm:$0xff] }
 0x684   :  { %v3507_v50 = vpack.c.bf16 %v2389_v46, %v2388_v34 }
 0x685   :  { %v4434_v40 = vadd.f32 %v2822_v26, %v2766_v13  ;;  %v2767_v37 = vpop.f32.mrb[28].mxu0  ;;  %v2390_v13 = vld [vmem:[#allocation9 + $0x60] sm:$0xff] }
 0x686   :  { %v2768_v52 = vpop.f32.mrb[29].mxu0 }
 0x687   :  { %v2769_v58 = vadd.f32 %v2768_v52, %v2767_v37  ;;  %v2391_v37 = vld [vmem:[#allocation9 + $0x68] sm:$0xff] }
 0x688   :  { %v3510_v52 = vpack.c.bf16 %v2391_v37, %v2390_v13 }
 0x689   :  { %v4436_v38 = vadd.f32 %v2825_v30, %v2769_v58  ;;  %v2770_v9 = vpop.f32.mrb[30].mxu0  ;;  %v2392_v58 = vld [vmem:[#allocation9 + $0x70] sm:$0xff] }
 0x68a   :  { %v2771_v44 = vpop.f32.mrb[31].mxu0 }
 0x68b   :  { %v2772_v4 = vadd.f32 %v2771_v44, %v2770_v9  ;;  %v2393_v9 = vld [vmem:[#allocation9 + $0x78] sm:$0xff] }
 0x68c   :  { %v3513_v44 = vpack.c.bf16 %v2393_v9, %v2392_v58 }
 0x68d   :  { %v4438_v7 = vadd.f32 %v2828_v51, %v2772_v4  ;;  %v2773_v23 = vpop.f32.mrb[32].mxu0  ;;  %v2378_v51 = vld [vmem:[#allocation9] sm:$0xff] }
 0x68e   :  { %v2774_v24 = vpop.f32.mrb[33].mxu0  ;;  %v3492_v5 = vpack.c.bf16 %v2379_v55, %v2378_v51 }
 0x68f   :  { %v2775_v10 = vadd.f32 %v2774_v24, %v2773_v23 }
 0x690   :  { %3493 = vmatpush3.bf16.msra.mxu0 %v3492_v5 }
 0x691   :  { %v4440_v11 = vadd.f32 %v2831_v8, %v2775_v10  ;;  %v2776_v2 = vpop.f32.mrb[34].mxu0  ;;  %3494 = vmatprep.subr.bf16.mxu0 %v3717_v39  ;;  %v2380_v8 = vld [vmem:[#allocation9 + $0x10] sm:$0xff] }
 0x692   :  { %v2777_v20 = vpop.f32.mrb[35].mxu0  ;;  %v3495_v21 = vpack.c.bf16 %v2381_v14, %v2380_v8 }
 0x693   :  { %v2778_v56 = vadd.f32 %v2777_v20, %v2776_v2 }
 0x694   :  { %3496 = vmatpush3.bf16.msra.mxu0 %v3495_v21 }
 0x695   :  { %v4442_v15 = vadd.f32 %v2834_v29, %v2778_v56  ;;  %v2779_v43 = vpop.f32.mrb[36].mxu0  ;;  %3497 = vmatprep.subr.bf16.mxu0 %v3717_v39  ;;  %v2382_v29 = vld [vmem:[#allocation9 + $0x20] sm:$0xff] }
 0x696   :  { %v2780_v33 = vpop.f32.mrb[37].mxu0  ;;  %v3498_v25 = vpack.c.bf16 %v2383_v61, %v2382_v29 }
 0x697   :  { %v2781_v41 = vadd.f32 %v2780_v33, %v2779_v43 }
 0x698   :  { %3499 = vmatpush3.bf16.msra.mxu0 %v3498_v25 }
 0x699   :  { %v4444_v42 = vadd.f32 %v2837_v28, %v2781_v41  ;;  %v2782_v47 = vpop.f32.mrb[38].mxu0  ;;  %3500 = vmatprep.subr.bf16.mxu0 %v3717_v39  ;;  %v2384_v28 = vld [vmem:[#allocation9 + $0x30] sm:$0xff] }
 0x69a   :  { %v2783_v48 = vpop.f32.mrb[39].mxu0  ;;  %v3501_v18 = vpack.c.bf16 %v2385_v36, %v2384_v28 }
 0x69b   :  { %v2784_v53 = vadd.f32 %v2783_v48, %v2782_v47 }
 0x69c   :  { %3502 = vmatpush3.bf16.msra.mxu0 %v3501_v18 }
 0x69d   :  { %v4446_v54 = vadd.f32 %v2840_v32, %v2784_v53  ;;  %v2151_v59 = vpop.f32.mrb[40].mxu0  ;;  %3503 = vmatprep.subr.bf16.mxu0 %v3717_v39  ;;  %v2386_v32 = vld [vmem:[#allocation9 + $0x40] sm:$0xff] }
 0x69e   :  { %v2153_v60 = vpop.f32.mrb[41].mxu0  ;;  %v3504_v19 = vpack.c.bf16 %v2387_v57, %v2386_v32 }
 0x69f   :  { %2295 = vmatprep.mubr.f32.mxu1 %v2153_v60 }
 0x6a0   :  { %2296 = vmatmul.mubr.f32.vlgmr.msra.gmra.mrb[72].mxu1 %v2151_v59  ;;  %3505 = vmatpush3.bf16.msra.mxu0 %v3504_v19 }
 0x6a1   :  { %v2157_v63 = vpop.f32.mrb[42].mxu0  ;;  %3517 = vmatpush3.bf16.msra.mxu1 %v3492_v5  ;;  %3506 = vmatprep.subr.bf16.mxu0 %v3717_v39 }
 0x6a2   :  { %v2159_v45 = vpop.f32.mrb[43].mxu0  ;;  %3518 = vmatprep.subr.bf16.mxu1 %v3717_v39 }
 0x6a3   :  { %2300 = vmatprep.mubr.f32.mxu1 %v2159_v45 }
 0x6a4   :  { %2301 = vmatmul.mubr.f32.gmra.mrb[74].mxu1 %v2157_v63  ;;  %3508 = vmatpush3.bf16.msra.mxu0 %v3507_v50 }
 0x6a5   :  { %v2163_v62 = vpop.f32.mrb[44].mxu0  ;;  %3520 = vmatpush3.bf16.msra.mxu1 %v3495_v21  ;;  %3509 = vmatprep.subr.bf16.mxu0 %v3717_v39 }
 0x6a6   :  { %v2165_v49 = vpop.f32.mrb[45].mxu0  ;;  %3521 = vmatprep.subr.bf16.mxu1 %v3717_v39 }
 0x6a7   :  { %2305 = vmatprep.mubr.f32.mxu1 %v2165_v49 }
 0x6a8   :  { %2306 = vmatmul.mubr.f32.gmra.mrb[76].mxu1 %v2163_v62  ;;  %3511 = vmatpush3.bf16.msra.mxu0 %v3510_v52 }
 0x6a9   :  { %v2169_v1 = vpop.f32.mrb[46].mxu0  ;;  %3523 = vmatpush3.bf16.msra.mxu1 %v3498_v25  ;;  %3512 = vmatprep.subr.bf16.mxu0 %v3717_v39 }
 0x6aa   :  { %v2171_v3 = vpop.f32.mrb[47].mxu0  ;;  %3524 = vmatprep.subr.bf16.mxu1 %v3717_v39 }
 0x6ab   :  { %2310 = vmatprep.mubr.f32.mxu1 %v2171_v3 }
 0x6ac   :  { %2311 = vmatmul.mubr.f32.gmra.mrb[78].mxu1 %v2169_v1  ;;  %3514 = vmatpush3.bf16.msra.mxu0 %v3513_v44 }
 0x6ad   :  { %v2175_v22 = vpop.f32.mrb[48].mxu0  ;;  %3526 = vmatpush3.bf16.msra.mxu1 %v3501_v18 }
 0x6ae   :  { %v2177_v16 = vpop.f32.mrb[49].mxu0  ;;  %3527 = vmatprep.subr.bf16.mxu1 %v3717_v39 }
 0x6af   :  { %2315 = vmatprep.mubr.f32.mxu1 %v2177_v16 }
 0x6b0   :  { %2316 = vmatmul.mubr.f32.gmra.mrb[80].mxu1 %v2175_v22 }
 0x6b1   :  { %v2181_v0 = vpop.f32.mrb[50].mxu0  ;;  %3529 = vmatpush3.bf16.msra.mxu1 %v3504_v19 }
 0x6b2   :  { %v2183_v26 = vpop.f32.mrb[51].mxu0  ;;  %3530 = vmatprep.subr.bf16.mxu1 %v3717_v39 }
 0x6b3   :  { %2320 = vmatprep.mubr.f32.mxu1 %v2183_v26 }
 0x6b4   :  { %2321 = vmatmul.mubr.f32.gmra.mrb[82].mxu1 %v2181_v0 }
 0x6b5   :  { %v2187_v6 = vpop.f32.mrb[52].mxu0  ;;  %3532 = vmatpush3.bf16.msra.mxu1 %v3507_v50 }
 0x6b6   :  { %v2189_v12 = vpop.f32.mrb[53].mxu0  ;;  %3533 = vmatprep.subr.bf16.mxu1 %v3717_v39 }
 0x6b7   :  { %2325 = vmatprep.mubr.f32.mxu1 %v2189_v12 }
 0x6b8   :  { %2326 = vmatmul.mubr.f32.gmra.mrb[84].mxu1 %v2187_v6 }
 0x6b9   :  { %v2193_v30 = vpop.f32.mrb[54].mxu0  ;;  %3535 = vmatpush3.bf16.msra.mxu1 %v3510_v52 }
 0x6ba   :  { %v2195_v35 = vpop.f32.mrb[55].mxu0  ;;  %3536 = vmatprep.subr.bf16.mxu1 %v3717_v39 }
 0x6bb   :  { %2330 = vmatprep.mubr.f32.mxu1 %v2195_v35 }
 0x6bc   :  { %2331 = vmatmul.mubr.f32.gmra.mrb[86].mxu1 %v2193_v30 }
 0x6bd   :  { %3080 = vmatprep.mubr.msk.f32.mxu1 %vm3718_vm2, %v4562_v31  ;;  %3538 = vmatpush3.bf16.msra.mxu1 %v3513_v44 }
 0x773   :  { %v2873_v4 = vpop.f32.mrb[72].mxu1 }
 0x774   :  { %v2874_v23 = vpop.f32.mrb[73].mxu1 }
 0x775   :  { %v2875_v24 = vadd.f32 %v2874_v23, %v2873_v4 }
 0x777   :  { %v4451_v10 = vadd.f32 %v2875_v24, %v4432_v27  ;;  %v2876_v2 = vpop.f32.mrb[74].mxu1 }
 0x778   :  { %v2877_v20 = vpop.f32.mrb[75].mxu1 }
 0x779   :  { %v2878_v56 = vadd.f32 %v2877_v20, %v2876_v2 }
 0x77b   :  { %v4454_v43 = vadd.f32 %v2878_v56, %v4434_v40  ;;  %v2879_v31 = vpop.f32.mrb[76].mxu1 }
 0x77c   :  { %v2880_v33 = vpop.f32.mrb[77].mxu1 }
 0x77d   :  { %v2881_v41 = vadd.f32 %v2880_v33, %v2879_v31  ;;  %v2358_v62 = vmul.f32 %v4454_v43, %v4454_v43  ;;  %v2344_v3 = vadd.f32 %v4454_v43, %v4451_v10 }
 0x77f   :  { %v4457_v47 = vadd.f32 %v2881_v41, %v4436_v38  ;;  %v2882_v48 = vpop.f32.mrb[78].mxu1  ;;  %v2357_v38 = vmul.f32 %v4451_v10, %v4451_v10 }
 0x780   :  { %v2883_v53 = vpop.f32.mrb[79].mxu1 }
 0x781   :  { %v2884_v59 = vadd.f32 %v2883_v53, %v2882_v48  ;;  %v2365_v16 = vadd.f32 %v2358_v62, %v2357_v38  ;;  %v2345_v0 = vadd.f32 %v2344_v3, %v4457_v47 }
 0x783   :  { %v4460_v60 = vadd.f32 %v2884_v59, %v4438_v7  ;;  %v2885_v27 = vpop.f32.mrb[80].mxu1  ;;  %v2359_v7 = vmul.f32 %v4457_v47, %v4457_v47 }
 0x784   :  { %v2886_v63 = vpop.f32.mrb[81].mxu1 }
 0x785   :  { %v2887_v45 = vadd.f32 %v2886_v63, %v2885_v27  ;;  %v2360_v26 = vmul.f32 %v4460_v60, %v4460_v60  ;;  %v2366_v30 = vadd.f32 %v2365_v16, %v2359_v7  ;;  %v2346_v35 = vadd.f32 %v2345_v0, %v4460_v60  ;;  %v2539_v63 = vld [vmem:[%s4530_s10] sm:$0x1] }
 0x787   :  { %v4465_v40 = vadd.f32 %v2887_v45, %v4440_v11  ;;  %v2888_v49 = vpop.f32.mrb[82].mxu1  ;;  %v2367_v55 = vadd.f32 %v2366_v30, %v2360_v26 }
 0x788   :  { %v2889_v1 = vpop.f32.mrb[83].mxu1 }
 0x789   :  { %v2890_v22 = vadd.f32 %v2889_v1, %v2888_v49  ;;  %v2361_v39 = vmul.f32 %v4465_v40, %v4465_v40  ;;  %v2347_v5 = vadd.f32 %v2346_v35, %v4465_v40  ;;  %v2543_v49 = vld [vmem:[%s4531_s11] sm:$0x1] }
 0x78b   :  { %v2341_v11 = vadd.f32 %v2890_v22, %v4442_v15  ;;  %v2891_v6 = vpop.f32.mrb[84].mxu1  ;;  %v2368_v61 = vadd.f32 %v2367_v55, %v2361_v39 }
 0x78c   :  { %v2892_v12 = vpop.f32.mrb[85].mxu1 }
 0x78d   :  { %v2893_v51 = vadd.f32 %v2892_v12, %v2891_v6  ;;  %v2362_v8 = vmul.f32 %v2341_v11, %v2341_v11  ;;  %v2348_v25 = vadd.f32 %v2347_v5, %v2341_v11 }
 0x78f   :  { %v2342_v14 = vadd.f32 %v2893_v51, %v4444_v42  ;;  %v2894_v21 = vpop.f32.mrb[86].mxu1  ;;  %v2369_v36 = vadd.f32 %v2368_v61, %v2362_v8 }
 0x790   :  { %v2895_v29 = vpop.f32.mrb[87].mxu1 }
 0x791   :  { %v2363_v15 = vmul.f32 %v2342_v14, %v2342_v14  ;;  %v2896_v28 = vadd.f32 %v2895_v29, %v2894_v21  ;;  %v2349_v18 = vadd.f32 %v2348_v25, %v2342_v14 }
 0x793   :  { %v2343_v32 = vadd.f32 %v2896_v28, %v4446_v54  ;;  %v2370_v57 = vadd.f32 %v2369_v36, %v2363_v15 }
 0x795   :  { %v2350_v19 = vadd.f32 %v2349_v18, %v2343_v32  ;;  %v2364_v34 = vmul.f32 %v2343_v32, %v2343_v32 }
 0x797   :  { %v2351_v46 = vrot.slane %v2350_v19, 4  ;;  %v2371_v50 = vadd.f32 %v2370_v57, %v2364_v34 }
 0x799   :  { %v2352_v13 = vadd.f32 %v2351_v46, %v2350_v19  ;;  %v2372_v37 = vrot.slane %v2371_v50, 4 }
 0x79b   :  { %v2353_v52 = vrot.slane %v2352_v13, 2  ;;  %v2373_v58 = vadd.f32 %v2372_v37, %v2371_v50 }
 0x79d   :  { %v2354_v42 = vadd.f32 %v2353_v52, %v2352_v13  ;;  %v2374_v9 = vrot.slane %v2373_v58, 2 }
 0x79f   :  { %v2355_v44 = vrot.slane %v2354_v42, 1  ;;  %v2375_v4 = vadd.f32 %v2374_v9, %v2373_v58 }
 0x7a1   :  { %v2356_v23 = vadd.f32 %v2355_v44, %v2354_v42  ;;  %v2376_v24 = vrot.slane %v2375_v4, 1 }
 0x7a3   :  { %3046 = vmatmul.mubr.f32.vlgmr.msra.gmra.mrb[56].mxu0 %v2356_v23  ;;  %v2377_v2 = vadd.f32 %v2376_v24, %v2375_v4 }
 0x7a5   :  { %3081 = vmatmul.mubr.f32.vlgmr.msra.gmra.mrb[88].mxu1 %v2377_v2 }
 0x876   :  { %v2460_v20 = vpop.f32.mrb[56].mxu0 }
 0x877   :  { %v2534_v54 = vmul.f32 0.00048828125, %v2460_v20  ;;  %v3047_v56 = vpop.f32.mrb[57].mxu0 }
 0x878   :  { %v2530_v31 = vpop.f32.mrb[88].mxu1 }
 0x879   :  { %v2536_v33 = vmul.f32 %v2534_v54, %v2534_v54  ;;  %v2535_v41 = vmul.f32 0.00048828125, %v2530_v31  ;;  %v3082_v48 = vpop.f32.mrb[89].mxu1 }
 0x87b   :  { %v2537_v53 = vsub.f32 %v2535_v41, %v2536_v33 }
 0x87d   :  { %v2538_v59 = vmax.f32 %v2537_v53, 0.0 }
 0x87f   :  { %v2540_v27 = vadd.f32 1e-05, %v2538_v59 }
 0x881   :  { %3588 = vrsqrt.f32 %v2540_v27 }
 0x88b   :  { %v3589_v45 = vpop.eup %3588 }
 0x88c   :  { %v2542_v62 = vmul.f32 %v3589_v45, %v2539_v63 }
 0x88e   :  { %v2544_v1 = vmul.f32 %v2542_v62, %v2534_v54  ;;  %v2550_v38 = vrot.slane %v2542_v62, %v4255_v17 }
 0x890   :  { %v2545_v3 = vsub.f32 %v2543_v49, %v2544_v1  ;;  %v2552_v7 = vmul.f32 %v2550_v38, %v4451_v10  ;;  %v2553_v22 = vmul.f32 %v2550_v38, %v4454_v43  ;;  %v2554_v16 = vmul.f32 %v2550_v38, %v4457_v47 }
 0x891   :  { %v2555_v0 = vmul.f32 %v2550_v38, %v4460_v60  ;;  %v2556_v6 = vmul.f32 %v2550_v38, %v4465_v40  ;;  %v2557_v12 = vmul.f32 %v2550_v38, %v2341_v11  ;;  %v2558_v30 = vmul.f32 %v2550_v38, %v2342_v14 }
 0x892   :  { %v2564_v26 = vrot.slane %v2545_v3, %v4255_v17  ;;  %v2559_v35 = vmul.f32 %v2550_v38, %v2343_v32 }
 0x894   :  { %v2566_v39 = vadd.f32 %v2564_v26, %v2552_v7  ;;  %v2567_v51 = vadd.f32 %v2564_v26, %v2553_v22  ;;  %v2568_v55 = vadd.f32 %v2564_v26, %v2554_v16  ;;  %v2569_v5 = vadd.f32 %v2564_v26, %v2555_v0 }
 0x895   :  { %v2570_v8 = vadd.f32 %v2564_v26, %v2556_v6  ;;  %v2571_v21 = vadd.f32 %v2564_v26, %v2557_v12  ;;  %v2572_v10 = vadd.f32 %v2564_v26, %v2558_v30  ;;  %v2573_v29 = vadd.f32 %v2564_v26, %v2559_v35 }
 0x896   :  { %v2574_v43 = vmax.f32 %v2566_v39, 0.0  ;;  %v2575_v61 = vmax.f32 %v2567_v51, 0.0  ;;  %v2576_v47 = vmax.f32 %v2568_v55, 0.0  ;;  %v2577_v25 = vmax.f32 %v2569_v5, 0.0 }
 0x897   :  { %v2578_v60 = vmax.f32 %v2570_v8, 0.0  ;;  %v2579_v15 = vmax.f32 %v2571_v21, 0.0  ;;  %v2580_v17 = vmax.f32 %v2572_v10, 0.0  ;;  %v2581_v28 = vmax.f32 %v2573_v29, 0.0 }
 0x898   :  { %2582 = vst [vmem:[%s4532_s12] sm:$0xff] %v2574_v43  ;;  %2583 = vst [vmem:[%s4532_s12 + $0x8] sm:$0xff] %v2575_v61 }
 0x899   :  { %2584 = vst [vmem:[%s4532_s12 + $0x10] sm:$0xff] %v2576_v47  ;;  %2585 = vst [vmem:[%s4532_s12 + $0x18] sm:$0xff] %v2577_v25 }
 0x89a   :  { %2586 = vst [vmem:[%s4532_s12 + $0x20] sm:$0xff] %v2578_v60  ;;  %2587 = vst [vmem:[%s4532_s12 + $0x28] sm:$0xff] %v2579_v15 }
 0x89b   :  { %2588 = vst [vmem:[%s4532_s12 + $0x30] sm:$0xff] %v2580_v17  ;;  %2589 = vst [vmem:[%s4532_s12 + $0x38] sm:$0xff] %v2581_v28 }
 0x89c   :  { %2594 = vsyncpa [#allocation3], 1 }
 0x89d   :  { %2595 = vsyncpa [#allocation5], 1 }
 0x89e   :  { %2596 = vsyncpa [#allocation8], 1 }

</bundles_post_ra>
